<compile_context>
chip_gen: v5e
topology: v5e:2x2
jax: 0.10.0
libtpu: 0.0.40
codegen_flags: <defaults>
</compile_context>

<pallas_src>
import functools

import jax
import jax.numpy as jnp
import numpy as np
from jax.experimental import pallas as pl
from jax.experimental.pallas import tpu as pltpu


# --------------------------------------------------------------------------------------
# Pallas kernel
# --------------------------------------------------------------------------------------
def addition_predictor_kernel(
    x_ref,        # [Te*B, E]   f32  time-major rows (row = t*B + b)
    h0e_ref,      # [B, He]     f32  initial encoder hidden
    c0e_ref,      # [B, He]     f32
    h0d_ref,      # [B, Hd]     f32  initial decoder hidden
    c0d_ref,      # [B, Hd]     f32
    wih_e_ref,    # [E,  4*He]  bf16 (i/f/o gate cols pre-scaled by 0.5)
    whh_e_ref,    # [He, 4*He]  bf16 (i/f/o gate cols pre-scaled by 0.5)
    b_e_ref,      # [1,  4*He]  f32  (b_ih + b_hh, i/f/o cols pre-scaled by 0.5)
    wih_d_ref,    # [He, 4*Hd]  bf16
    whh_d_ref,    # [Hd, 4*Hd]  bf16
    b_d_ref,      # [1,  4*Hd]  f32
    wfc_ref,      # [Hd, O]     bf16
    bfc_ref,      # [1, O]      f32
    out_ref,      # [Td*B, O]   f32  time-major softmax outputs
    xproj_ref,    # scratch [Te*B, 4*He] f32   encoder input projections
    hs_ref,       # scratch [Td*B, Hd]   f32   decoder hidden states (FC input)
):
    B, He = h0e_ref.shape
    Hd = h0d_ref.shape[1]
    Te = x_ref.shape[0] // B
    Td = out_ref.shape[0] // B

    # ---- LSTM cell -------------------------------------------------------------------
    # Gates are packed [i | f | g | o] into exactly 4*H lanes (one vreg at H=32).
    # Because the i/f/o columns of the weights & bias were pre-scaled by 0.5, a single
    # whole-vreg tanh yields sigmoid for i/f/o via 0.5*t + 0.5 and tanh for g directly:
    # 2 EUP pushes per step (tanh(gates), tanh(c_new)) instead of 5.
    def lstm_step(x_proj, h, c, whh, H):
        gates = x_proj + jnp.dot(h, whh, preferred_element_type=jnp.float32)  # [B, 4H]
        t = jnp.tanh(gates)
        s = 0.5 * t + 0.5
        i = s[:, 0 * H:1 * H]
        f = s[:, 1 * H:2 * H]
        g = t[:, 2 * H:3 * H]
        o = s[:, 3 * H:4 * H]
        c_new = f * c + i * g
        h_new = o * jnp.tanh(c_new)
        return h_new, c_new

    # ---- 1) all encoder input projections in ONE matmul -------------------------------
    # bf16 weights are converted to f32 exactly once, outside all loops.
    wih_e = wih_e_ref[...].astype(jnp.float32)
    whh_e = whh_e_ref[...].astype(jnp.float32)
    xproj_ref[...] = (
        jnp.dot(x_ref[...], wih_e, preferred_element_type=jnp.float32) + b_e_ref[...]
    )

    # ---- 2) encoder recurrence (only h @ W_hh + gate math on the serial chain) --------
    def enc_body(t, carry):
        h, c = carry
        xp = xproj_ref[pl.ds(t * B, B), :]
        return lstm_step(xp, h, c, whh_e, He)

    h_enc, _ = jax.lax.fori_loop(
        0, Te, enc_body, (h0e_ref[...], c0e_ref[...]), unroll=True)

    # ---- 3) decoder recurrence ---------------------------------------------------------
    # The decoder input at every step is the repeated last encoder hidden state, so its
    # input projection is loop-invariant: compute it once.
    wih_d = wih_d_ref[...].astype(jnp.float32)
    whh_d = whh_d_ref[...].astype(jnp.float32)
    xproj_d = (
        jnp.dot(h_enc, wih_d, preferred_element_type=jnp.float32) + b_d_ref[...]
    )

    def dec_body(t, carry):
        h, c = carry
        h_new, c_new = lstm_step(xproj_d, h, c, whh_d, Hd)
        hs_ref[pl.ds(t * B, B), :] = h_new        # off the recurrence dependency chain
        return h_new, c_new

    jax.lax.fori_loop(0, Td, dec_body, (h0d_ref[...], c0d_ref[...]), unroll=True)

    # ---- 4) one batched FC + one softmax + a single bulk store -------------------------
    wfc = wfc_ref[...].astype(jnp.float32)
    logits = (
        jnp.dot(hs_ref[...], wfc, preferred_element_type=jnp.float32) + bfc_ref[...]
    )                                              # [Td*B, O]
    m = jnp.max(logits, axis=-1, keepdims=True)
    e = jnp.exp(logits - m)
    out_ref[...] = e / jnp.sum(e, axis=-1, keepdims=True)   # exact; runs once


# --------------------------------------------------------------------------------------
# One-time parameter preparation (cached & reused across forward calls).
# --------------------------------------------------------------------------------------
def prepare_params(params):
    """Pre-scale i/f/o gate columns by 0.5 (single-tanh trick) and cast matmul weights
    to bf16.  Biases stay f32.  Called once; nothing here sits on the steady-state path."""
    def gate_scale(H):
        return jnp.concatenate([
            jnp.full((2 * H,), 0.5, jnp.float32),   # i, f
            jnp.ones((H,), jnp.float32),            # g
            jnp.full((H,), 0.5, jnp.float32),       # o
        ])[None, :]

    He = params["whh_e"].shape[0]
    Hd = params["whh_d"].shape[0]

    def prep_w(name, H):
        # bf16-roundtrip first (these are the effective weight values), then apply the
        # exact power-of-two pre-scaling and store as bf16 for half the DMA bytes.
        wq = params[name].astype(jnp.bfloat16).astype(jnp.float32)
        return (wq * gate_scale(H)).astype(jnp.bfloat16)

    return {
        "wih_e": prep_w("wih_e", He),
        "whh_e": prep_w("whh_e", He),
        "b_e": params["b_e"] * gate_scale(He),
        "wih_d": prep_w("wih_d", Hd),
        "whh_d": prep_w("whh_d", Hd),
        "b_d": params["b_d"] * gate_scale(Hd),
        "wfc": params["wfc"].astype(jnp.bfloat16),
        "bfc": params["bfc"],
    }


# --------------------------------------------------------------------------------------
# Wrapper
# --------------------------------------------------------------------------------------
def addition_predictor_forward(x, h0e, c0e, h0d, c0d, prepared, dec_seqlen, output_dim):
    """x: [B, Te, E] (batch_first, like PyTorch). Returns [B, Td, O]."""
    B, Te, E = x.shape
    Td = dec_seqlen
    O = output_dim
    He = h0e.shape[1]
    Hd = h0d.shape[1]

    x2d = jnp.transpose(x, (1, 0, 2)).reshape(Te * B, E)     # time-major rows

    operands = (
        x2d, h0e, c0e, h0d, c0d,
        prepared["wih_e"], prepared["whh_e"], prepared["b_e"],
        prepared["wih_d"], prepared["whh_d"], prepared["b_d"],
        prepared["wfc"], prepared["bfc"],
    )

    vmem = pl.BlockSpec(memory_space=pltpu.MemorySpace.VMEM)
    out = pl.pallas_call(
        addition_predictor_kernel,
        out_shape=jax.ShapeDtypeStruct((Td * B, O), jnp.float32),
        in_specs=[vmem] * len(operands),
        out_specs=vmem,
        scratch_shapes=[
            pltpu.VMEM((Te * B, 4 * He), jnp.float32),   # encoder input projections
            pltpu.VMEM((Td * B, Hd), jnp.float32),       # decoder hidden states
        ],
    )(*operands)

    return jnp.transpose(out.reshape(Td, B, O), (1, 0, 2))   # [B, Td, O]


# --------------------------------------------------------------------------------------
# Parameter init (PyTorch LSTM/Linear-style uniform(-1/sqrt(H), 1/sqrt(H)); weights are
# stored pre-transposed as [in_dim, 4*H] so the kernel does x @ W on the MXU).
# --------------------------------------------------------------------------------------
def make_params(key, enc_embed_dim, enc_hidden_dim, dec_hidden_dim, output_dim):
    ks = jax.random.split(key, 10)

    def unif(k, shape, H):
        bound = 1.0 / np.sqrt(H)
        return jax.random.uniform(k, shape, jnp.float32, -bound, bound)

    He, Hd = enc_hidden_dim, dec_hidden_dim
    return {
        "wih_e": unif(ks[0], (enc_embed_dim, 4 * He), He),
        "whh_e": unif(ks[1], (He, 4 * He), He),
        "b_e": unif(ks[2], (1, 4 * He), He) + unif(ks[3], (1, 4 * He), He),
        "wih_d": unif(ks[4], (He, 4 * Hd), Hd),
        "whh_d": unif(ks[5], (Hd, 4 * Hd), Hd),
        "b_d": unif(ks[6], (1, 4 * Hd), Hd) + unif(ks[7], (1, 4 * Hd), Hd),
        "wfc": unif(ks[8], (Hd, output_dim), Hd),
        "bfc": unif(ks[9], (1, output_dim), Hd),
    }


# --------------------------------------------------------------------------------------
# Pure-JAX reference for correctness checking.
# --------------------------------------------------------------------------------------
def _lstm_ref(xseq, h, c, wih, whh, b):
    H = h.shape[1]
    outs = []
    for t in range(xseq.shape[1]):
        gates = xseq[:, t, :] @ wih + h @ whh + b
        i = jax.nn.sigmoid(gates[:, 0 * H:1 * H])
        f = jax.nn.sigmoid(gates[:, 1 * H:2 * H])
        g = jnp.tanh(gates[:, 2 * H:3 * H])
        o = jax.nn.sigmoid(gates[:, 3 * H:4 * H])
        c = f * c + i * g
        h = o * jnp.tanh(c)
        outs.append(h)
    return h, jnp.stack(outs, axis=1)


def reference_forward(x, h0e, c0e, h0d, c0d, params, dec_seqlen):
    h_enc, _ = _lstm_ref(x, h0e, c0e, params["wih_e"], params["whh_e"], params["b_e"])
    dec_in = jnp.repeat(h_enc[:, None, :], dec_seqlen, axis=1)
    _, hs = _lstm_ref(dec_in, h0d, c0d, params["wih_d"], params["whh_d"], params["b_d"])
    logits = hs @ params["wfc"] + params["bfc"]
    return jax.nn.softmax(logits, axis=-1)


def _quantized_like_kernel(params):
    """Weight values the kernel effectively uses (bf16-roundtripped matmul weights)."""
    q = dict(params)
    for k in ("wih_e", "whh_e", "wih_d", "whh_d", "wfc"):
        q[k] = params[k].astype(jnp.bfloat16).astype(jnp.float32)
    return q


# --------------------------------------------------------------------------------------
if __name__ == "__main__":
    B = 2
    enc_seqlen = 8
    enc_embed_dim = 12
    enc_hidden_dim = 32
    dec_seqlen = 8
    dec_hidden_dim = 32
    output_dim = 12

    root = jax.random.PRNGKey(0)
    k_x, k_p, k_he, k_ce, k_hd, k_cd = jax.random.split(root, 6)

    x = jax.random.normal(k_x, (B, enc_seqlen, enc_embed_dim), jnp.float32)
    params = make_params(k_p, enc_embed_dim, enc_hidden_dim,
                         dec_hidden_dim, output_dim)

    # One-time parameter preparation (gate packing / pre-scaling / bf16 cast), cached
    # and reused for every forward call.
    prepared = prepare_params(params)

    # The PyTorch forward draws fresh random initial states (torch.randn) each call;
    # here they are deterministic PRNG draws passed explicitly.
    h0e = jax.random.normal(k_he, (B, enc_hidden_dim), jnp.float32)
    c0e = jax.random.normal(k_ce, (B, enc_hidden_dim), jnp.float32)
    h0d = jax.random.normal(k_hd, (B, dec_hidden_dim), jnp.float32)
    c0d = jax.random.normal(k_cd, (B, dec_hidden_dim), jnp.float32)

    fwd = jax.jit(functools.partial(addition_predictor_forward,
                                    dec_seqlen=dec_seqlen,
                                    output_dim=output_dim))
    out = jax.block_until_ready(fwd(x, h0e, c0e, h0d, c0d, prepared))

    assert out.shape == (B, dec_seqlen, output_dim)
    out_np = np.asarray(out)
    assert np.all(np.isfinite(out_np))
    # Exact softmax reciprocal -> rows sum to 1 at f32 precision.
    assert np.allclose(out_np.sum(axis=-1), 1.0, atol=1e-4)

    # Tight check: pure-JAX reference using the same (bf16-roundtripped) weight values
    # the kernel uses -> isolates kernel-implementation error from quantization choice.
    ref_q = np.asarray(reference_forward(
        x, h0e, c0e, h0d, c0d, _quantized_like_kernel(params), dec_seqlen))
    assert np.allclose(out_np, ref_q, atol=5e-3, rtol=5e-3)

    # Loose check against the full-f32 reference (bounds the bf16 weight quantization).
    ref_f32 = np.asarray(reference_forward(x, h0e, c0e, h0d, c0d, params, dec_seqlen))
    assert np.allclose(out_np, ref_f32, atol=5e-2, rtol=5e-2)

    print("KERNEL_OK")
</pallas_src>

<mosaic_0001>
module attributes {stable_mosaic.version = 11 : i64} {
  func.func @addition_predictor_kernel(%arg0: memref<16x12xf32, #tpu.memory_space<vmem>>, %arg1: memref<2x32xf32, #tpu.memory_space<vmem>>, %arg2: memref<2x32xf32, #tpu.memory_space<vmem>>, %arg3: memref<2x32xf32, #tpu.memory_space<vmem>>, %arg4: memref<2x32xf32, #tpu.memory_space<vmem>>, %arg5: memref<12x128xbf16, #tpu.memory_space<vmem>>, %arg6: memref<32x128xbf16, #tpu.memory_space<vmem>>, %arg7: memref<1x128xf32, #tpu.memory_space<vmem>>, %arg8: memref<32x128xbf16, #tpu.memory_space<vmem>>, %arg9: memref<32x128xbf16, #tpu.memory_space<vmem>>, %arg10: memref<1x128xf32, #tpu.memory_space<vmem>>, %arg11: memref<32x12xbf16, #tpu.memory_space<vmem>>, %arg12: memref<1x12xf32, #tpu.memory_space<vmem>>, %arg13: memref<16x12xf32, #tpu.memory_space<vmem>>, %arg14: memref<16x128xf32, #tpu.memory_space<vmem>>, %arg15: memref<16x32xf32, #tpu.memory_space<vmem>>) attributes {dimension_semantics = [], scalar_prefetch = 0 : i64, scratch_operands = 2 : i64, tpu.core_type = #tpu.core_type<tc>} {
    %c0 = arith.constant 0 : index
    %c0_0 = arith.constant 0 : index
    %0 = vector.load %arg5[%c0, %c0_0] : memref<12x128xbf16, #tpu.memory_space<vmem>>, vector<12x128xbf16>
    %1 = arith.extf %0 : vector<12x128xbf16> to vector<12x128xf32>
    %c0_1 = arith.constant 0 : index
    %c0_2 = arith.constant 0 : index
    %2 = vector.load %arg6[%c0_1, %c0_2] : memref<32x128xbf16, #tpu.memory_space<vmem>>, vector<32x128xbf16>
    %3 = arith.extf %2 : vector<32x128xbf16> to vector<32x128xf32>
    %c0_3 = arith.constant 0 : index
    %c0_4 = arith.constant 0 : index
    %4 = vector.load %arg0[%c0_3, %c0_4] : memref<16x12xf32, #tpu.memory_space<vmem>>, vector<16x12xf32>
    %cst = arith.constant dense<0.000000e+00> : vector<16x128xf32>
    %5 = tpu.matmul %4, %1, %cst {dimension_numbers = #tpu.dot_dimension_numbers<[1], [0], [0], [1], [0, 0, 1, 1], [], []>} : vector<16x12xf32>, vector<12x128xf32>, vector<16x128xf32> -> vector<16x128xf32>
    %c0_5 = arith.constant 0 : index
    %c0_6 = arith.constant 0 : index
    %6 = vector.load %arg7[%c0_5, %c0_6] : memref<1x128xf32, #tpu.memory_space<vmem>>, vector<1x128xf32>
    %7 = vector.broadcast %6 : vector<1x128xf32> to vector<16x128xf32>
    %8 = arith.addf %5, %7 : vector<16x128xf32>
    %c0_7 = arith.constant 0 : index
    %c0_8 = arith.constant 0 : index
    %9 = vector.load %arg14[%c0_7, %c0_8] : memref<16x128xf32, #tpu.memory_space<vmem>>, vector<16x128xf32>
    tpu.vector_store %arg14[%c0_7, %c0_8], %8 {strides = array<i32>} : memref<16x128xf32, #tpu.memory_space<vmem>>, vector<16x128xf32>,
    %c0_9 = arith.constant 0 : index
    %c0_10 = arith.constant 0 : index
    %10 = vector.load %arg1[%c0_9, %c0_10] : memref<2x32xf32, #tpu.memory_space<vmem>>, vector<2x32xf32>
    %c0_11 = arith.constant 0 : index
    %c0_12 = arith.constant 0 : index
    %11 = vector.load %arg2[%c0_11, %c0_12] : memref<2x32xf32, #tpu.memory_space<vmem>>, vector<2x32xf32>
    %c0_i32 = arith.constant 0 : i32
    %c2_i32 = arith.constant 2 : i32
    %12 = arith.muli %c0_i32, %c2_i32 : i32
    %13 = arith.index_cast %12 : i32 to index
    %c0_13 = arith.constant 0 : index
    %14 = vector.load %arg14[%13, %c0_13] : memref<16x128xf32, #tpu.memory_space<vmem>>, vector<2x128xf32>
    %cst_14 = arith.constant dense<0.000000e+00> : vector<2x128xf32>
    %15 = tpu.matmul %10, %3, %cst_14 {dimension_numbers = #tpu.dot_dimension_numbers<[1], [0], [0], [1], [0, 0, 1, 1], [], []>} : vector<2x32xf32>, vector<32x128xf32>, vector<2x128xf32> -> vector<2x128xf32>
    %16 = arith.addf %14, %15 : vector<2x128xf32>
    %17 = math.tanh %16 : vector<2x128xf32>
    %cst_15 = arith.constant 5.000000e-01 : f32
    %18 = vector.broadcast %cst_15 : f32 to vector<2x128xf32>
    %19 = arith.mulf %18, %17 : vector<2x128xf32>
    %cst_16 = arith.constant 5.000000e-01 : f32
    %20 = vector.broadcast %cst_16 : f32 to vector<2x128xf32>
    %21 = arith.addf %19, %20 : vector<2x128xf32>
    %22 = vector.extract_strided_slice %21 {offsets = [0, 0], sizes = [2, 32], strides = [1, 1]} : vector<2x128xf32> to vector<2x32xf32>
    %23 = vector.extract_strided_slice %21 {offsets = [0, 32], sizes = [2, 32], strides = [1, 1]} : vector<2x128xf32> to vector<2x32xf32>
    %24 = vector.extract_strided_slice %17 {offsets = [0, 64], sizes = [2, 32], strides = [1, 1]} : vector<2x128xf32> to vector<2x32xf32>
    %25 = vector.extract_strided_slice %21 {offsets = [0, 96], sizes = [2, 32], strides = [1, 1]} : vector<2x128xf32> to vector<2x32xf32>
    %26 = arith.mulf %23, %11 : vector<2x32xf32>
    %27 = arith.mulf %22, %24 : vector<2x32xf32>
    %28 = arith.addf %26, %27 : vector<2x32xf32>
    %29 = math.tanh %28 : vector<2x32xf32>
    %30 = arith.mulf %25, %29 : vector<2x32xf32>
    %c1_i32 = arith.constant 1 : i32
    %c2_i32_17 = arith.constant 2 : i32
    %31 = arith.muli %c1_i32, %c2_i32_17 : i32
    %32 = arith.index_cast %31 : i32 to index
    %c0_18 = arith.constant 0 : index
    %33 = vector.load %arg14[%32, %c0_18] : memref<16x128xf32, #tpu.memory_space<vmem>>, vector<2x128xf32>
    %cst_19 = arith.constant dense<0.000000e+00> : vector<2x128xf32>
    %34 = tpu.matmul %30, %3, %cst_19 {dimension_numbers = #tpu.dot_dimension_numbers<[1], [0], [0], [1], [0, 0, 1, 1], [], []>} : vector<2x32xf32>, vector<32x128xf32>, vector<2x128xf32> -> vector<2x128xf32>
    %35 = arith.addf %33, %34 : vector<2x128xf32>
    %36 = math.tanh %35 : vector<2x128xf32>
    %cst_20 = arith.constant 5.000000e-01 : f32
    %37 = vector.broadcast %cst_20 : f32 to vector<2x128xf32>
    %38 = arith.mulf %37, %36 : vector<2x128xf32>
    %cst_21 = arith.constant 5.000000e-01 : f32
    %39 = vector.broadcast %cst_21 : f32 to vector<2x128xf32>
    %40 = arith.addf %38, %39 : vector<2x128xf32>
    %41 = vector.extract_strided_slice %40 {offsets = [0, 0], sizes = [2, 32], strides = [1, 1]} : vector<2x128xf32> to vector<2x32xf32>
    %42 = vector.extract_strided_slice %40 {offsets = [0, 32], sizes = [2, 32], strides = [1, 1]} : vector<2x128xf32> to vector<2x32xf32>
    %43 = vector.extract_strided_slice %36 {offsets = [0, 64], sizes = [2, 32], strides = [1, 1]} : vector<2x128xf32> to vector<2x32xf32>
    %44 = vector.extract_strided_slice %40 {offsets = [0, 96], sizes = [2, 32], strides = [1, 1]} : vector<2x128xf32> to vector<2x32xf32>
    %45 = arith.mulf %42, %28 : vector<2x32xf32>
    %46 = arith.mulf %41, %43 : vector<2x32xf32>
    %47 = arith.addf %45, %46 : vector<2x32xf32>
    %48 = math.tanh %47 : vector<2x32xf32>
    %49 = arith.mulf %44, %48 : vector<2x32xf32>
    %c2_i32_22 = arith.constant 2 : i32
    %c2_i32_23 = arith.constant 2 : i32
    %50 = arith.muli %c2_i32_22, %c2_i32_23 : i32
    %51 = arith.index_cast %50 : i32 to index
    %c0_24 = arith.constant 0 : index
    %52 = vector.load %arg14[%51, %c0_24] : memref<16x128xf32, #tpu.memory_space<vmem>>, vector<2x128xf32>
    %cst_25 = arith.constant dense<0.000000e+00> : vector<2x128xf32>
    %53 = tpu.matmul %49, %3, %cst_25 {dimension_numbers = #tpu.dot_dimension_numbers<[1], [0], [0], [1], [0, 0, 1, 1], [], []>} : vector<2x32xf32>, vector<32x128xf32>, vector<2x128xf32> -> vector<2x128xf32>
    %54 = arith.addf %52, %53 : vector<2x128xf32>
    %55 = math.tanh %54 : vector<2x128xf32>
    %cst_26 = arith.constant 5.000000e-01 : f32
    %56 = vector.broadcast %cst_26 : f32 to vector<2x128xf32>
    %57 = arith.mulf %56, %55 : vector<2x128xf32>
    %cst_27 = arith.constant 5.000000e-01 : f32
    %58 = vector.broadcast %cst_27 : f32 to vector<2x128xf32>
    %59 = arith.addf %57, %58 : vector<2x128xf32>
    %60 = vector.extract_strided_slice %59 {offsets = [0, 0], sizes = [2, 32], strides = [1, 1]} : vector<2x128xf32> to vector<2x32xf32>
    %61 = vector.extract_strided_slice %59 {offsets = [0, 32], sizes = [2, 32], strides = [1, 1]} : vector<2x128xf32> to vector<2x32xf32>
    %62 = vector.extract_strided_slice %55 {offsets = [0, 64], sizes = [2, 32], strides = [1, 1]} : vector<2x128xf32> to vector<2x32xf32>
    %63 = vector.extract_strided_slice %59 {offsets = [0, 96], sizes = [2, 32], strides = [1, 1]} : vector<2x128xf32> to vector<2x32xf32>
    %64 = arith.mulf %61, %47 : vector<2x32xf32>
    %65 = arith.mulf %60, %62 : vector<2x32xf32>
    %66 = arith.addf %64, %65 : vector<2x32xf32>
    %67 = math.tanh %66 : vector<2x32xf32>
    %68 = arith.mulf %63, %67 : vector<2x32xf32>
    %c3_i32 = arith.constant 3 : i32
    %c2_i32_28 = arith.constant 2 : i32
    %69 = arith.muli %c3_i32, %c2_i32_28 : i32
    %70 = arith.index_cast %69 : i32 to index
    %c0_29 = arith.constant 0 : index
    %71 = vector.load %arg14[%70, %c0_29] : memref<16x128xf32, #tpu.memory_space<vmem>>, vector<2x128xf32>
    %cst_30 = arith.constant dense<0.000000e+00> : vector<2x128xf32>
    %72 = tpu.matmul %68, %3, %cst_30 {dimension_numbers = #tpu.dot_dimension_numbers<[1], [0], [0], [1], [0, 0, 1, 1], [], []>} : vector<2x32xf32>, vector<32x128xf32>, vector<2x128xf32> -> vector<2x128xf32>
    %73 = arith.addf %71, %72 : vector<2x128xf32>
    %74 = math.tanh %73 : vector<2x128xf32>
    %cst_31 = arith.constant 5.000000e-01 : f32
    %75 = vector.broadcast %cst_31 : f32 to vector<2x128xf32>
    %76 = arith.mulf %75, %74 : vector<2x128xf32>
    %cst_32 = arith.constant 5.000000e-01 : f32
    %77 = vector.broadcast %cst_32 : f32 to vector<2x128xf32>
    %78 = arith.addf %76, %77 : vector<2x128xf32>
    %79 = vector.extract_strided_slice %78 {offsets = [0, 0], sizes = [2, 32], strides = [1, 1]} : vector<2x128xf32> to vector<2x32xf32>
    %80 = vector.extract_strided_slice %78 {offsets = [0, 32], sizes = [2, 32], strides = [1, 1]} : vector<2x128xf32> to vector<2x32xf32>
    %81 = vector.extract_strided_slice %74 {offsets = [0, 64], sizes = [2, 32], strides = [1, 1]} : vector<2x128xf32> to vector<2x32xf32>
    %82 = vector.extract_strided_slice %78 {offsets = [0, 96], sizes = [2, 32], strides = [1, 1]} : vector<2x128xf32> to vector<2x32xf32>
    %83 = arith.mulf %80, %66 : vector<2x32xf32>
    %84 = arith.mulf %79, %81 : vector<2x32xf32>
    %85 = arith.addf %83, %84 : vector<2x32xf32>
    %86 = math.tanh %85 : vector<2x32xf32>
    %87 = arith.mulf %82, %86 : vector<2x32xf32>
    %c4_i32 = arith.constant 4 : i32
    %c2_i32_33 = arith.constant 2 : i32
    %88 = arith.muli %c4_i32, %c2_i32_33 : i32
    %89 = arith.index_cast %88 : i32 to index
    %c0_34 = arith.constant 0 : index
    %90 = vector.load %arg14[%89, %c0_34] : memref<16x128xf32, #tpu.memory_space<vmem>>, vector<2x128xf32>
    %cst_35 = arith.constant dense<0.000000e+00> : vector<2x128xf32>
    %91 = tpu.matmul %87, %3, %cst_35 {dimension_numbers = #tpu.dot_dimension_numbers<[1], [0], [0], [1], [0, 0, 1, 1], [], []>} : vector<2x32xf32>, vector<32x128xf32>, vector<2x128xf32> -> vector<2x128xf32>
    %92 = arith.addf %90, %91 : vector<2x128xf32>
    %93 = math.tanh %92 : vector<2x128xf32>
    %cst_36 = arith.constant 5.000000e-01 : f32
    %94 = vector.broadcast %cst_36 : f32 to vector<2x128xf32>
    %95 = arith.mulf %94, %93 : vector<2x128xf32>
    %cst_37 = arith.constant 5.000000e-01 : f32
    %96 = vector.broadcast %cst_37 : f32 to vector<2x128xf32>
    %97 = arith.addf %95, %96 : vector<2x128xf32>
    %98 = vector.extract_strided_slice %97 {offsets = [0, 0], sizes = [2, 32], strides = [1, 1]} : vector<2x128xf32> to vector<2x32xf32>
    %99 = vector.extract_strided_slice %97 {offsets = [0, 32], sizes = [2, 32], strides = [1, 1]} : vector<2x128xf32> to vector<2x32xf32>
    %100 = vector.extract_strided_slice %93 {offsets = [0, 64], sizes = [2, 32], strides = [1, 1]} : vector<2x128xf32> to vector<2x32xf32>
    %101 = vector.extract_strided_slice %97 {offsets = [0, 96], sizes = [2, 32], strides = [1, 1]} : vector<2x128xf32> to vector<2x32xf32>
    %102 = arith.mulf %99, %85 : vector<2x32xf32>
    %103 = arith.mulf %98, %100 : vector<2x32xf32>
    %104 = arith.addf %102, %103 : vector<2x32xf32>
    %105 = math.tanh %104 : vector<2x32xf32>
    %106 = arith.mulf %101, %105 : vector<2x32xf32>
    %c5_i32 = arith.constant 5 : i32
    %c2_i32_38 = arith.constant 2 : i32
    %107 = arith.muli %c5_i32, %c2_i32_38 : i32
    %108 = arith.index_cast %107 : i32 to index
    %c0_39 = arith.constant 0 : index
    %109 = vector.load %arg14[%108, %c0_39] : memref<16x128xf32, #tpu.memory_space<vmem>>, vector<2x128xf32>
    %cst_40 = arith.constant dense<0.000000e+00> : vector<2x128xf32>
    %110 = tpu.matmul %106, %3, %cst_40 {dimension_numbers = #tpu.dot_dimension_numbers<[1], [0], [0], [1], [0, 0, 1, 1], [], []>} : vector<2x32xf32>, vector<32x128xf32>, vector<2x128xf32> -> vector<2x128xf32>
    %111 = arith.addf %109, %110 : vector<2x128xf32>
    %112 = math.tanh %111 : vector<2x128xf32>
    %cst_41 = arith.constant 5.000000e-01 : f32
    %113 = vector.broadcast %cst_41 : f32 to vector<2x128xf32>
    %114 = arith.mulf %113, %112 : vector<2x128xf32>
    %cst_42 = arith.constant 5.000000e-01 : f32
    %115 = vector.broadcast %cst_42 : f32 to vector<2x128xf32>
    %116 = arith.addf %114, %115 : vector<2x128xf32>
    %117 = vector.extract_strided_slice %116 {offsets = [0, 0], sizes = [2, 32], strides = [1, 1]} : vector<2x128xf32> to vector<2x32xf32>
    %118 = vector.extract_strided_slice %116 {offsets = [0, 32], sizes = [2, 32], strides = [1, 1]} : vector<2x128xf32> to vector<2x32xf32>
    %119 = vector.extract_strided_slice %112 {offsets = [0, 64], sizes = [2, 32], strides = [1, 1]} : vector<2x128xf32> to vector<2x32xf32>
    %120 = vector.extract_strided_slice %116 {offsets = [0, 96], sizes = [2, 32], strides = [1, 1]} : vector<2x128xf32> to vector<2x32xf32>
    %121 = arith.mulf %118, %104 : vector<2x32xf32>
    %122 = arith.mulf %117, %119 : vector<2x32xf32>
    %123 = arith.addf %121, %122 : vector<2x32xf32>
    %124 = math.tanh %123 : vector<2x32xf32>
    %125 = arith.mulf %120, %124 : vector<2x32xf32>
    %c6_i32 = arith.constant 6 : i32
    %c2_i32_43 = arith.constant 2 : i32
    %126 = arith.muli %c6_i32, %c2_i32_43 : i32
    %127 = arith.index_cast %126 : i32 to index
    %c0_44 = arith.constant 0 : index
    %128 = vector.load %arg14[%127, %c0_44] : memref<16x128xf32, #tpu.memory_space<vmem>>, vector<2x128xf32>
    %cst_45 = arith.constant dense<0.000000e+00> : vector<2x128xf32>
    %129 = tpu.matmul %125, %3, %cst_45 {dimension_numbers = #tpu.dot_dimension_numbers<[1], [0], [0], [1], [0, 0, 1, 1], [], []>} : vector<2x32xf32>, vector<32x128xf32>, vector<2x128xf32> -> vector<2x128xf32>
    %130 = arith.addf %128, %129 : vector<2x128xf32>
    %131 = math.tanh %130 : vector<2x128xf32>
    %cst_46 = arith.constant 5.000000e-01 : f32
    %132 = vector.broadcast %cst_46 : f32 to vector<2x128xf32>
    %133 = arith.mulf %132, %131 : vector<2x128xf32>
    %cst_47 = arith.constant 5.000000e-01 : f32
    %134 = vector.broadcast %cst_47 : f32 to vector<2x128xf32>
    %135 = arith.addf %133, %134 : vector<2x128xf32>
    %136 = vector.extract_strided_slice %135 {offsets = [0, 0], sizes = [2, 32], strides = [1, 1]} : vector<2x128xf32> to vector<2x32xf32>
    %137 = vector.extract_strided_slice %135 {offsets = [0, 32], sizes = [2, 32], strides = [1, 1]} : vector<2x128xf32> to vector<2x32xf32>
    %138 = vector.extract_strided_slice %131 {offsets = [0, 64], sizes = [2, 32], strides = [1, 1]} : vector<2x128xf32> to vector<2x32xf32>
    %139 = vector.extract_strided_slice %135 {offsets = [0, 96], sizes = [2, 32], strides = [1, 1]} : vector<2x128xf32> to vector<2x32xf32>
    %140 = arith.mulf %137, %123 : vector<2x32xf32>
    %141 = arith.mulf %136, %138 : vector<2x32xf32>
    %142 = arith.addf %140, %141 : vector<2x32xf32>
    %143 = math.tanh %142 : vector<2x32xf32>
    %144 = arith.mulf %139, %143 : vector<2x32xf32>
    %c7_i32 = arith.constant 7 : i32
    %c2_i32_48 = arith.constant 2 : i32
    %145 = arith.muli %c7_i32, %c2_i32_48 : i32
    %146 = arith.index_cast %145 : i32 to index
    %c0_49 = arith.constant 0 : index
    %147 = vector.load %arg14[%146, %c0_49] : memref<16x128xf32, #tpu.memory_space<vmem>>, vector<2x128xf32>
    %cst_50 = arith.constant dense<0.000000e+00> : vector<2x128xf32>
    %148 = tpu.matmul %144, %3, %cst_50 {dimension_numbers = #tpu.dot_dimension_numbers<[1], [0], [0], [1], [0, 0, 1, 1], [], []>} : vector<2x32xf32>, vector<32x128xf32>, vector<2x128xf32> -> vector<2x128xf32>
    %149 = arith.addf %147, %148 : vector<2x128xf32>
    %150 = math.tanh %149 : vector<2x128xf32>
    %cst_51 = arith.constant 5.000000e-01 : f32
    %151 = vector.broadcast %cst_51 : f32 to vector<2x128xf32>
    %152 = arith.mulf %151, %150 : vector<2x128xf32>
    %cst_52 = arith.constant 5.000000e-01 : f32
    %153 = vector.broadcast %cst_52 : f32 to vector<2x128xf32>
    %154 = arith.addf %152, %153 : vector<2x128xf32>
    %155 = vector.extract_strided_slice %154 {offsets = [0, 0], sizes = [2, 32], strides = [1, 1]} : vector<2x128xf32> to vector<2x32xf32>
    %156 = vector.extract_strided_slice %154 {offsets = [0, 32], sizes = [2, 32], strides = [1, 1]} : vector<2x128xf32> to vector<2x32xf32>
    %157 = vector.extract_strided_slice %150 {offsets = [0, 64], sizes = [2, 32], strides = [1, 1]} : vector<2x128xf32> to vector<2x32xf32>
    %158 = vector.extract_strided_slice %154 {offsets = [0, 96], sizes = [2, 32], strides = [1, 1]} : vector<2x128xf32> to vector<2x32xf32>
    %159 = arith.mulf %156, %142 : vector<2x32xf32>
    %160 = arith.mulf %155, %157 : vector<2x32xf32>
    %161 = arith.addf %159, %160 : vector<2x32xf32>
    %162 = math.tanh %161 : vector<2x32xf32>
    %163 = arith.mulf %158, %162 : vector<2x32xf32>
    %c8_i32 = arith.constant 8 : i32
    %c0_53 = arith.constant 0 : index
    %c0_54 = arith.constant 0 : index
    %164 = vector.load %arg8[%c0_53, %c0_54] : memref<32x128xbf16, #tpu.memory_space<vmem>>, vector<32x128xbf16>
    %165 = arith.extf %164 : vector<32x128xbf16> to vector<32x128xf32>
    %c0_55 = arith.constant 0 : index
    %c0_56 = arith.constant 0 : index
    %166 = vector.load %arg9[%c0_55, %c0_56] : memref<32x128xbf16, #tpu.memory_space<vmem>>, vector<32x128xbf16>
    %167 = arith.extf %166 : vector<32x128xbf16> to vector<32x128xf32>
    %cst_57 = arith.constant dense<0.000000e+00> : vector<2x128xf32>
    %168 = tpu.matmul %163, %165, %cst_57 {dimension_numbers = #tpu.dot_dimension_numbers<[1], [0], [0], [1], [0, 0, 1, 1], [], []>} : vector<2x32xf32>, vector<32x128xf32>, vector<2x128xf32> -> vector<2x128xf32>
    %c0_58 = arith.constant 0 : index
    %c0_59 = arith.constant 0 : index
    %169 = vector.load %arg10[%c0_58, %c0_59] : memref<1x128xf32, #tpu.memory_space<vmem>>, vector<1x128xf32>
    %170 = vector.broadcast %169 : vector<1x128xf32> to vector<2x128xf32>
    %171 = arith.addf %168, %170 : vector<2x128xf32>
    %c0_60 = arith.constant 0 : index
    %c0_61 = arith.constant 0 : index
    %172 = vector.load %arg3[%c0_60, %c0_61] : memref<2x32xf32, #tpu.memory_space<vmem>>, vector<2x32xf32>
    %c0_62 = arith.constant 0 : index
    %c0_63 = arith.constant 0 : index
    %173 = vector.load %arg4[%c0_62, %c0_63] : memref<2x32xf32, #tpu.memory_space<vmem>>, vector<2x32xf32>
    %c0_i32_64 = arith.constant 0 : i32
    %cst_65 = arith.constant dense<0.000000e+00> : vector<2x128xf32>
    %174 = tpu.matmul %172, %167, %cst_65 {dimension_numbers = #tpu.dot_dimension_numbers<[1], [0], [0], [1], [0, 0, 1, 1], [], []>} : vector<2x32xf32>, vector<32x128xf32>, vector<2x128xf32> -> vector<2x128xf32>
    %175 = arith.addf %171, %174 : vector<2x128xf32>
    %176 = math.tanh %175 : vector<2x128xf32>
    %cst_66 = arith.constant 5.000000e-01 : f32
    %177 = vector.broadcast %cst_66 : f32 to vector<2x128xf32>
    %178 = arith.mulf %177, %176 : vector<2x128xf32>
    %cst_67 = arith.constant 5.000000e-01 : f32
    %179 = vector.broadcast %cst_67 : f32 to vector<2x128xf32>
    %180 = arith.addf %178, %179 : vector<2x128xf32>
    %181 = vector.extract_strided_slice %180 {offsets = [0, 0], sizes = [2, 32], strides = [1, 1]} : vector<2x128xf32> to vector<2x32xf32>
    %182 = vector.extract_strided_slice %180 {offsets = [0, 32], sizes = [2, 32], strides = [1, 1]} : vector<2x128xf32> to vector<2x32xf32>
    %183 = vector.extract_strided_slice %176 {offsets = [0, 64], sizes = [2, 32], strides = [1, 1]} : vector<2x128xf32> to vector<2x32xf32>
    %184 = vector.extract_strided_slice %180 {offsets = [0, 96], sizes = [2, 32], strides = [1, 1]} : vector<2x128xf32> to vector<2x32xf32>
    %185 = arith.mulf %182, %173 : vector<2x32xf32>
    %186 = arith.mulf %181, %183 : vector<2x32xf32>
    %187 = arith.addf %185, %186 : vector<2x32xf32>
    %188 = math.tanh %187 : vector<2x32xf32>
    %189 = arith.mulf %184, %188 : vector<2x32xf32>
    %c2_i32_68 = arith.constant 2 : i32
    %190 = arith.muli %c0_i32_64, %c2_i32_68 : i32
    %191 = arith.index_cast %190 : i32 to index
    %c0_69 = arith.constant 0 : index
    %192 = vector.load %arg15[%191, %c0_69] : memref<16x32xf32, #tpu.memory_space<vmem>>, vector<2x32xf32>
    tpu.vector_store %arg15[%191, %c0_69], %189 {strides = array<i32>} : memref<16x32xf32, #tpu.memory_space<vmem>>, vector<2x32xf32>,
    %c1_i32_70 = arith.constant 1 : i32
    %cst_71 = arith.constant dense<0.000000e+00> : vector<2x128xf32>
    %193 = tpu.matmul %189, %167, %cst_71 {dimension_numbers = #tpu.dot_dimension_numbers<[1], [0], [0], [1], [0, 0, 1, 1], [], []>} : vector<2x32xf32>, vector<32x128xf32>, vector<2x128xf32> -> vector<2x128xf32>
    %194 = arith.addf %171, %193 : vector<2x128xf32>
    %195 = math.tanh %194 : vector<2x128xf32>
    %cst_72 = arith.constant 5.000000e-01 : f32
    %196 = vector.broadcast %cst_72 : f32 to vector<2x128xf32>
    %197 = arith.mulf %196, %195 : vector<2x128xf32>
    %cst_73 = arith.constant 5.000000e-01 : f32
    %198 = vector.broadcast %cst_73 : f32 to vector<2x128xf32>
    %199 = arith.addf %197, %198 : vector<2x128xf32>
    %200 = vector.extract_strided_slice %199 {offsets = [0, 0], sizes = [2, 32], strides = [1, 1]} : vector<2x128xf32> to vector<2x32xf32>
    %201 = vector.extract_strided_slice %199 {offsets = [0, 32], sizes = [2, 32], strides = [1, 1]} : vector<2x128xf32> to vector<2x32xf32>
    %202 = vector.extract_strided_slice %195 {offsets = [0, 64], sizes = [2, 32], strides = [1, 1]} : vector<2x128xf32> to vector<2x32xf32>
    %203 = vector.extract_strided_slice %199 {offsets = [0, 96], sizes = [2, 32], strides = [1, 1]} : vector<2x128xf32> to vector<2x32xf32>
    %204 = arith.mulf %201, %187 : vector<2x32xf32>
    %205 = arith.mulf %200, %202 : vector<2x32xf32>
    %206 = arith.addf %204, %205 : vector<2x32xf32>
    %207 = math.tanh %206 : vector<2x32xf32>
    %208 = arith.mulf %203, %207 : vector<2x32xf32>
    %c2_i32_74 = arith.constant 2 : i32
    %209 = arith.muli %c1_i32_70, %c2_i32_74 : i32
    %210 = arith.index_cast %209 : i32 to index
    %c0_75 = arith.constant 0 : index
    %211 = vector.load %arg15[%210, %c0_75] : memref<16x32xf32, #tpu.memory_space<vmem>>, vector<2x32xf32>
    tpu.vector_store %arg15[%210, %c0_75], %208 {strides = array<i32>} : memref<16x32xf32, #tpu.memory_space<vmem>>, vector<2x32xf32>,
    %c2_i32_76 = arith.constant 2 : i32
    %cst_77 = arith.constant dense<0.000000e+00> : vector<2x128xf32>
    %212 = tpu.matmul %208, %167, %cst_77 {dimension_numbers = #tpu.dot_dimension_numbers<[1], [0], [0], [1], [0, 0, 1, 1], [], []>} : vector<2x32xf32>, vector<32x128xf32>, vector<2x128xf32> -> vector<2x128xf32>
    %213 = arith.addf %171, %212 : vector<2x128xf32>
    %214 = math.tanh %213 : vector<2x128xf32>
    %cst_78 = arith.constant 5.000000e-01 : f32
    %215 = vector.broadcast %cst_78 : f32 to vector<2x128xf32>
    %216 = arith.mulf %215, %214 : vector<2x128xf32>
    %cst_79 = arith.constant 5.000000e-01 : f32
    %217 = vector.broadcast %cst_79 : f32 to vector<2x128xf32>
    %218 = arith.addf %216, %217 : vector<2x128xf32>
    %219 = vector.extract_strided_slice %218 {offsets = [0, 0], sizes = [2, 32], strides = [1, 1]} : vector<2x128xf32> to vector<2x32xf32>
    %220 = vector.extract_strided_slice %218 {offsets = [0, 32], sizes = [2, 32], strides = [1, 1]} : vector<2x128xf32> to vector<2x32xf32>
    %221 = vector.extract_strided_slice %214 {offsets = [0, 64], sizes = [2, 32], strides = [1, 1]} : vector<2x128xf32> to vector<2x32xf32>
    %222 = vector.extract_strided_slice %218 {offsets = [0, 96], sizes = [2, 32], strides = [1, 1]} : vector<2x128xf32> to vector<2x32xf32>
    %223 = arith.mulf %220, %206 : vector<2x32xf32>
    %224 = arith.mulf %219, %221 : vector<2x32xf32>
    %225 = arith.addf %223, %224 : vector<2x32xf32>
    %226 = math.tanh %225 : vector<2x32xf32>
    %227 = arith.mulf %222, %226 : vector<2x32xf32>
    %c2_i32_80 = arith.constant 2 : i32
    %228 = arith.muli %c2_i32_76, %c2_i32_80 : i32
    %229 = arith.index_cast %228 : i32 to index
    %c0_81 = arith.constant 0 : index
    %230 = vector.load %arg15[%229, %c0_81] : memref<16x32xf32, #tpu.memory_space<vmem>>, vector<2x32xf32>
    tpu.vector_store %arg15[%229, %c0_81], %227 {strides = array<i32>} : memref<16x32xf32, #tpu.memory_space<vmem>>, vector<2x32xf32>,
    %c3_i32_82 = arith.constant 3 : i32
    %cst_83 = arith.constant dense<0.000000e+00> : vector<2x128xf32>
    %231 = tpu.matmul %227, %167, %cst_83 {dimension_numbers = #tpu.dot_dimension_numbers<[1], [0], [0], [1], [0, 0, 1, 1], [], []>} : vector<2x32xf32>, vector<32x128xf32>, vector<2x128xf32> -> vector<2x128xf32>
    %232 = arith.addf %171, %231 : vector<2x128xf32>
    %233 = math.tanh %232 : vector<2x128xf32>
    %cst_84 = arith.constant 5.000000e-01 : f32
    %234 = vector.broadcast %cst_84 : f32 to vector<2x128xf32>
    %235 = arith.mulf %234, %233 : vector<2x128xf32>
    %cst_85 = arith.constant 5.000000e-01 : f32
    %236 = vector.broadcast %cst_85 : f32 to vector<2x128xf32>
    %237 = arith.addf %235, %236 : vector<2x128xf32>
    %238 = vector.extract_strided_slice %237 {offsets = [0, 0], sizes = [2, 32], strides = [1, 1]} : vector<2x128xf32> to vector<2x32xf32>
    %239 = vector.extract_strided_slice %237 {offsets = [0, 32], sizes = [2, 32], strides = [1, 1]} : vector<2x128xf32> to vector<2x32xf32>
    %240 = vector.extract_strided_slice %233 {offsets = [0, 64], sizes = [2, 32], strides = [1, 1]} : vector<2x128xf32> to vector<2x32xf32>
    %241 = vector.extract_strided_slice %237 {offsets = [0, 96], sizes = [2, 32], strides = [1, 1]} : vector<2x128xf32> to vector<2x32xf32>
    %242 = arith.mulf %239, %225 : vector<2x32xf32>
    %243 = arith.mulf %238, %240 : vector<2x32xf32>
    %244 = arith.addf %242, %243 : vector<2x32xf32>
    %245 = math.tanh %244 : vector<2x32xf32>
    %246 = arith.mulf %241, %245 : vector<2x32xf32>
    %c2_i32_86 = arith.constant 2 : i32
    %247 = arith.muli %c3_i32_82, %c2_i32_86 : i32
    %248 = arith.index_cast %247 : i32 to index
    %c0_87 = arith.constant 0 : index
    %249 = vector.load %arg15[%248, %c0_87] : memref<16x32xf32, #tpu.memory_space<vmem>>, vector<2x32xf32>
    tpu.vector_store %arg15[%248, %c0_87], %246 {strides = array<i32>} : memref<16x32xf32, #tpu.memory_space<vmem>>, vector<2x32xf32>,
    %c4_i32_88 = arith.constant 4 : i32
    %cst_89 = arith.constant dense<0.000000e+00> : vector<2x128xf32>
    %250 = tpu.matmul %246, %167, %cst_89 {dimension_numbers = #tpu.dot_dimension_numbers<[1], [0], [0], [1], [0, 0, 1, 1], [], []>} : vector<2x32xf32>, vector<32x128xf32>, vector<2x128xf32> -> vector<2x128xf32>
    %251 = arith.addf %171, %250 : vector<2x128xf32>
    %252 = math.tanh %251 : vector<2x128xf32>
    %cst_90 = arith.constant 5.000000e-01 : f32
    %253 = vector.broadcast %cst_90 : f32 to vector<2x128xf32>
    %254 = arith.mulf %253, %252 : vector<2x128xf32>
    %cst_91 = arith.constant 5.000000e-01 : f32
    %255 = vector.broadcast %cst_91 : f32 to vector<2x128xf32>
    %256 = arith.addf %254, %255 : vector<2x128xf32>
    %257 = vector.extract_strided_slice %256 {offsets = [0, 0], sizes = [2, 32], strides = [1, 1]} : vector<2x128xf32> to vector<2x32xf32>
    %258 = vector.extract_strided_slice %256 {offsets = [0, 32], sizes = [2, 32], strides = [1, 1]} : vector<2x128xf32> to vector<2x32xf32>
    %259 = vector.extract_strided_slice %252 {offsets = [0, 64], sizes = [2, 32], strides = [1, 1]} : vector<2x128xf32> to vector<2x32xf32>
    %260 = vector.extract_strided_slice %256 {offsets = [0, 96], sizes = [2, 32], strides = [1, 1]} : vector<2x128xf32> to vector<2x32xf32>
    %261 = arith.mulf %258, %244 : vector<2x32xf32>
    %262 = arith.mulf %257, %259 : vector<2x32xf32>
    %263 = arith.addf %261, %262 : vector<2x32xf32>
    %264 = math.tanh %263 : vector<2x32xf32>
    %265 = arith.mulf %260, %264 : vector<2x32xf32>
    %c2_i32_92 = arith.constant 2 : i32
    %266 = arith.muli %c4_i32_88, %c2_i32_92 : i32
    %267 = arith.index_cast %266 : i32 to index
    %c0_93 = arith.constant 0 : index
    %268 = vector.load %arg15[%267, %c0_93] : memref<16x32xf32, #tpu.memory_space<vmem>>, vector<2x32xf32>
    tpu.vector_store %arg15[%267, %c0_93], %265 {strides = array<i32>} : memref<16x32xf32, #tpu.memory_space<vmem>>, vector<2x32xf32>,
    %c5_i32_94 = arith.constant 5 : i32
    %cst_95 = arith.constant dense<0.000000e+00> : vector<2x128xf32>
    %269 = tpu.matmul %265, %167, %cst_95 {dimension_numbers = #tpu.dot_dimension_numbers<[1], [0], [0], [1], [0, 0, 1, 1], [], []>} : vector<2x32xf32>, vector<32x128xf32>, vector<2x128xf32> -> vector<2x128xf32>
    %270 = arith.addf %171, %269 : vector<2x128xf32>
    %271 = math.tanh %270 : vector<2x128xf32>
    %cst_96 = arith.constant 5.000000e-01 : f32
    %272 = vector.broadcast %cst_96 : f32 to vector<2x128xf32>
    %273 = arith.mulf %272, %271 : vector<2x128xf32>
    %cst_97 = arith.constant 5.000000e-01 : f32
    %274 = vector.broadcast %cst_97 : f32 to vector<2x128xf32>
    %275 = arith.addf %273, %274 : vector<2x128xf32>
    %276 = vector.extract_strided_slice %275 {offsets = [0, 0], sizes = [2, 32], strides = [1, 1]} : vector<2x128xf32> to vector<2x32xf32>
    %277 = vector.extract_strided_slice %275 {offsets = [0, 32], sizes = [2, 32], strides = [1, 1]} : vector<2x128xf32> to vector<2x32xf32>
    %278 = vector.extract_strided_slice %271 {offsets = [0, 64], sizes = [2, 32], strides = [1, 1]} : vector<2x128xf32> to vector<2x32xf32>
    %279 = vector.extract_strided_slice %275 {offsets = [0, 96], sizes = [2, 32], strides = [1, 1]} : vector<2x128xf32> to vector<2x32xf32>
    %280 = arith.mulf %277, %263 : vector<2x32xf32>
    %281 = arith.mulf %276, %278 : vector<2x32xf32>
    %282 = arith.addf %280, %281 : vector<2x32xf32>
    %283 = math.tanh %282 : vector<2x32xf32>
    %284 = arith.mulf %279, %283 : vector<2x32xf32>
    %c2_i32_98 = arith.constant 2 : i32
    %285 = arith.muli %c5_i32_94, %c2_i32_98 : i32
    %286 = arith.index_cast %285 : i32 to index
    %c0_99 = arith.constant 0 : index
    %287 = vector.load %arg15[%286, %c0_99] : memref<16x32xf32, #tpu.memory_space<vmem>>, vector<2x32xf32>
    tpu.vector_store %arg15[%286, %c0_99], %284 {strides = array<i32>} : memref<16x32xf32, #tpu.memory_space<vmem>>, vector<2x32xf32>,
    %c6_i32_100 = arith.constant 6 : i32
    %cst_101 = arith.constant dense<0.000000e+00> : vector<2x128xf32>
    %288 = tpu.matmul %284, %167, %cst_101 {dimension_numbers = #tpu.dot_dimension_numbers<[1], [0], [0], [1], [0, 0, 1, 1], [], []>} : vector<2x32xf32>, vector<32x128xf32>, vector<2x128xf32> -> vector<2x128xf32>
    %289 = arith.addf %171, %288 : vector<2x128xf32>
    %290 = math.tanh %289 : vector<2x128xf32>
    %cst_102 = arith.constant 5.000000e-01 : f32
    %291 = vector.broadcast %cst_102 : f32 to vector<2x128xf32>
    %292 = arith.mulf %291, %290 : vector<2x128xf32>
    %cst_103 = arith.constant 5.000000e-01 : f32
    %293 = vector.broadcast %cst_103 : f32 to vector<2x128xf32>
    %294 = arith.addf %292, %293 : vector<2x128xf32>
    %295 = vector.extract_strided_slice %294 {offsets = [0, 0], sizes = [2, 32], strides = [1, 1]} : vector<2x128xf32> to vector<2x32xf32>
    %296 = vector.extract_strided_slice %294 {offsets = [0, 32], sizes = [2, 32], strides = [1, 1]} : vector<2x128xf32> to vector<2x32xf32>
    %297 = vector.extract_strided_slice %290 {offsets = [0, 64], sizes = [2, 32], strides = [1, 1]} : vector<2x128xf32> to vector<2x32xf32>
    %298 = vector.extract_strided_slice %294 {offsets = [0, 96], sizes = [2, 32], strides = [1, 1]} : vector<2x128xf32> to vector<2x32xf32>
    %299 = arith.mulf %296, %282 : vector<2x32xf32>
    %300 = arith.mulf %295, %297 : vector<2x32xf32>
    %301 = arith.addf %299, %300 : vector<2x32xf32>
    %302 = math.tanh %301 : vector<2x32xf32>
    %303 = arith.mulf %298, %302 : vector<2x32xf32>
    %c2_i32_104 = arith.constant 2 : i32
    %304 = arith.muli %c6_i32_100, %c2_i32_104 : i32
    %305 = arith.index_cast %304 : i32 to index
    %c0_105 = arith.constant 0 : index
    %306 = vector.load %arg15[%305, %c0_105] : memref<16x32xf32, #tpu.memory_space<vmem>>, vector<2x32xf32>
    tpu.vector_store %arg15[%305, %c0_105], %303 {strides = array<i32>} : memref<16x32xf32, #tpu.memory_space<vmem>>, vector<2x32xf32>,
    %c7_i32_106 = arith.constant 7 : i32
    %cst_107 = arith.constant dense<0.000000e+00> : vector<2x128xf32>
    %307 = tpu.matmul %303, %167, %cst_107 {dimension_numbers = #tpu.dot_dimension_numbers<[1], [0], [0], [1], [0, 0, 1, 1], [], []>} : vector<2x32xf32>, vector<32x128xf32>, vector<2x128xf32> -> vector<2x128xf32>
    %308 = arith.addf %171, %307 : vector<2x128xf32>
    %309 = math.tanh %308 : vector<2x128xf32>
    %cst_108 = arith.constant 5.000000e-01 : f32
    %310 = vector.broadcast %cst_108 : f32 to vector<2x128xf32>
    %311 = arith.mulf %310, %309 : vector<2x128xf32>
    %cst_109 = arith.constant 5.000000e-01 : f32
    %312 = vector.broadcast %cst_109 : f32 to vector<2x128xf32>
    %313 = arith.addf %311, %312 : vector<2x128xf32>
    %314 = vector.extract_strided_slice %313 {offsets = [0, 0], sizes = [2, 32], strides = [1, 1]} : vector<2x128xf32> to vector<2x32xf32>
    %315 = vector.extract_strided_slice %313 {offsets = [0, 32], sizes = [2, 32], strides = [1, 1]} : vector<2x128xf32> to vector<2x32xf32>
    %316 = vector.extract_strided_slice %309 {offsets = [0, 64], sizes = [2, 32], strides = [1, 1]} : vector<2x128xf32> to vector<2x32xf32>
    %317 = vector.extract_strided_slice %313 {offsets = [0, 96], sizes = [2, 32], strides = [1, 1]} : vector<2x128xf32> to vector<2x32xf32>
    %318 = arith.mulf %315, %301 : vector<2x32xf32>
    %319 = arith.mulf %314, %316 : vector<2x32xf32>
    %320 = arith.addf %318, %319 : vector<2x32xf32>
    %321 = math.tanh %320 : vector<2x32xf32>
    %322 = arith.mulf %317, %321 : vector<2x32xf32>
    %c2_i32_110 = arith.constant 2 : i32
    %323 = arith.muli %c7_i32_106, %c2_i32_110 : i32
    %324 = arith.index_cast %323 : i32 to index
    %c0_111 = arith.constant 0 : index
    %325 = vector.load %arg15[%324, %c0_111] : memref<16x32xf32, #tpu.memory_space<vmem>>, vector<2x32xf32>
    tpu.vector_store %arg15[%324, %c0_111], %322 {strides = array<i32>} : memref<16x32xf32, #tpu.memory_space<vmem>>, vector<2x32xf32>,
    %c8_i32_112 = arith.constant 8 : i32
    %c0_113 = arith.constant 0 : index
    %c0_114 = arith.constant 0 : index
    %326 = vector.load %arg11[%c0_113, %c0_114] : memref<32x12xbf16, #tpu.memory_space<vmem>>, vector<32x12xbf16>
    %327 = arith.extf %326 : vector<32x12xbf16> to vector<32x12xf32>
    %c0_115 = arith.constant 0 : index
    %c0_116 = arith.constant 0 : index
    %328 = vector.load %arg15[%c0_115, %c0_116] : memref<16x32xf32, #tpu.memory_space<vmem>>, vector<16x32xf32>
    %cst_117 = arith.constant dense<0.000000e+00> : vector<16x12xf32>
    %329 = tpu.matmul %328, %327, %cst_117 {dimension_numbers = #tpu.dot_dimension_numbers<[1], [0], [0], [1], [0, 0, 1, 1], [], []>} : vector<16x32xf32>, vector<32x12xf32>, vector<16x12xf32> -> vector<16x12xf32>
    %c0_118 = arith.constant 0 : index
    %c0_119 = arith.constant 0 : index
    %330 = vector.load %arg12[%c0_118, %c0_119] : memref<1x12xf32, #tpu.memory_space<vmem>>, vector<1x12xf32>
    %331 = vector.broadcast %330 : vector<1x12xf32> to vector<16x12xf32>
    %332 = arith.addf %329, %331 : vector<16x12xf32>
    %cst_120 = arith.constant dense<0xFF800000> : vector<16xf32>
    %333 = vector.multi_reduction <maximumf>, %332, %cst_120 [1] : vector<16x12xf32> to vector<16xf32>
    %334 = vector.shape_cast %333 : vector<16xf32> to vector<16x1xf32>
    %335 = vector.broadcast %334 : vector<16x1xf32> to vector<16x12xf32>
    %336 = arith.subf %332, %335 : vector<16x12xf32>
    %337 = math.exp %336 : vector<16x12xf32>
    %cst_121 = arith.constant dense<0.000000e+00> : vector<16xf32>
    %338 = vector.multi_reduction <add>, %337, %cst_121 [1] : vector<16x12xf32> to vector<16xf32>
    %339 = vector.shape_cast %338 : vector<16xf32> to vector<16x1xf32>
    %340 = vector.broadcast %339 : vector<16x1xf32> to vector<16x12xf32>
    %341 = arith.divf %337, %340 : vector<16x12xf32>
    %c0_122 = arith.constant 0 : index
    %c0_123 = arith.constant 0 : index
    %342 = vector.load %arg13[%c0_122, %c0_123] : memref<16x12xf32, #tpu.memory_space<vmem>>, vector<16x12xf32>
    tpu.vector_store %arg13[%c0_122, %c0_123], %341 {strides = array<i32>} : memref<16x12xf32, #tpu.memory_space<vmem>>, vector<16x12xf32>,
    return
  }
}

</mosaic_0001>

<bundles_post_ra>
// kernel: addition_predictor_forward.1
= control target key start
LH: loop header
LB: loop body
LE: loop exit
PB: predicated region body
PF: predicated region fallthrough
CT: control target
= control target key end

     0   :  { %18 = vsyncpa [#allocation5], 0  ;;  %s1683_s0 = inlined_call_operand.vmem [shape: f32[16,12], index: 0, kind: input, shape index: {}]   ;;  %s1684_s1 = inlined_call_operand.hbm [shape: f32[2,32], index: 1, kind: input, shape index: {}]   ;;  %s1685_s2 = inlined_call_operand.hbm [shape: f32[2,32], index: 2, kind: input, shape index: {}]   ;;  %s1686_s3 = inlined_call_operand.hbm [shape: f32[2,32], index: 3, kind: input, shape index: {}]   ;;  %s1687_s4 = inlined_call_operand.hbm [shape: f32[2,32], index: 4, kind: input, shape index: {}]   ;;  %s1688_s5 = inlined_call_operand.vmem [shape: bf16[12,128], index: 5, kind: input, shape index: {}]   ;;  %s1689_s6 = inlined_call_operand.vmem [shape: bf16[32,128], index: 6, kind: input, shape index: {}]   ;;  %s1690_s7 = inlined_call_operand.hbm [shape: f32[1,128], index: 7, kind: input, shape index: {}]   ;;  %s1691_s8 = inlined_call_operand.vmem [shape: bf16[32,128], index: 8, kind: input, shape index: {}]   ;;  %s1692_s9 = inlined_call_operand.vmem [shape: bf16[32,128], index: 9, kind: input, shape index: {}]   ;;  %s1693_s10 = inlined_call_operand.hbm [shape: f32[1,128], index: 10, kind: input, shape index: {}]   ;;  %s1694_s11 = inlined_call_operand.vmem [shape: bf16[32,12], index: 11, kind: input, shape index: {}]   ;;  %s1695_s12 = inlined_call_operand.hbm [shape: f32[1,12], index: 12, kind: input, shape index: {}]   ;;  %s1696_s13 = inlined_call_operand.vmem [shape: f32[16,12], index: 13, kind: output, shape index: {}]  }
   0x1   :  { %19 = vsyncpa [#allocation7], 0 }
   0x2   :  { %20 = vsyncpa [#allocation10], 0  ;;  %s40_s27 = sshll.u32 %s1685_s2, 4  ;;  %s41_s27 = int_to_ptr.hbm [resolvable:$true] %s40_s27 }
   0x3   :  { %21 = vsyncpa [#allocation13], 0  ;;  %s1430_s28 = smov [#allocation6]   ;;  %s62_s15 = sshll.u32 %s1687_s4, 4  ;;  %s63_s15 = int_to_ptr.hbm [resolvable:$true] %s62_s15 }
   0x4   :  { %s42_s29 = sshll.u32 %s1430_s28, 4  ;;  %s1431_s16 = smov [#allocation9]   ;;  %s43_s29 = int_to_ptr.vmem [resolvable:$true] %s42_s29 }
   0x5   :  { %45 = dma.hbm_to_vmem [thread:$0]  %s41_s27, 32, %s43_s29, [#allocation7]  }
   0x6   :  { %s64_s17 = sshll.u32 %s1431_s16, 4  ;;  %s92_s20 = sshll.u32 %s1693_s10, 4  ;;  %s65_s17 = int_to_ptr.vmem [resolvable:$true] %s64_s17  ;;  %s93_s20 = int_to_ptr.hbm [resolvable:$true] %s92_s20 }
   0x7   :  { %67 = dma.hbm_to_vmem [thread:$0]  %s63_s15, 32, %s65_s17, [#allocation10]  }
   0x8   :  { %s29_s22 = sshll.u32 %s1684_s1, 4  ;;  %s1432_s23 = smov [#allocation12]   ;;  %s30_s22 = int_to_ptr.hbm [resolvable:$true] %s29_s22 }
   0x9   :  { %s94_s24 = sshll.u32 %s1432_s23, 4  ;;  %s1433_s4 = smov [#allocation4]   ;;  %s95_s24 = int_to_ptr.vmem [resolvable:$true] %s94_s24 }
   0xa   :  { %97 = dma.hbm_to_vmem [thread:$0]  %s93_s20, 16, %s95_s24, [#allocation13]  }
   0xb   :  { %s31_s25 = sshll.u32 %s1433_s4, 4  ;;  %s51_s28 = sshll.u32 %s1686_s3, 4  ;;  %s32_s25 = int_to_ptr.vmem [resolvable:$true] %s31_s25  ;;  %s52_s28 = int_to_ptr.hbm [resolvable:$true] %s51_s28 }
   0xc   :  { %34 = dma.hbm_to_vmem [thread:$0]  %s30_s22, 32, %s32_s25, [#allocation5]  }
   0xd   :  { %s77_s30 = sshll.u32 %s1690_s7, 4  ;;  %s1434_s14 = smov [#allocation8]   ;;  %s78_s30 = int_to_ptr.hbm [resolvable:$true] %s77_s30 }
   0xe   :  { %s53_s1 = sshll.u32 %s1434_s14, 4  ;;  %s1435_s15 = smov [#allocation11]   ;;  %s54_s1 = int_to_ptr.vmem [resolvable:$true] %s53_s1 }
   0xf   :  { %56 = dma.hbm_to_vmem [thread:$0]  %s52_s28, 32, %s54_s1, [#allocation7]  }
  0x10   :  { %s79_s16 = sshll.u32 %s1435_s15, 4  ;;  %s105_s19 = sshll.u32 %s1695_s12, 4  ;;  %s80_s16 = int_to_ptr.vmem [resolvable:$true] %s79_s16  ;;  %s106_s19 = int_to_ptr.hbm [resolvable:$true] %s105_s19 }
  0x11   :  { %82 = dma.hbm_to_vmem [thread:$0]  %s78_s30, 16, %s80_s16, [#allocation10]  }
  0x12   :  { %s1436_s3 = smov [#allocation14]  }
  0x13   :  { %s107_s20 = sshll.u32 %s1436_s3, 4  ;;  %s108_s20 = int_to_ptr.vmem [resolvable:$true] %s107_s20 }
  0x14   :  { %110 = dma.hbm_to_vmem [thread:$0]  %s106_s19, 16, %s108_s20, [#allocation13]  }
  0x15   :  { %1422 = dma.done.wait [#allocation5], 32  }
  0x16   :  { %1423 = vsyncadd [#allocation5], 4294967264 }
  0x17   :  { %1424 = dma.done.wait [#allocation7], 64  }
  0x18   :  { %1425 = vsyncadd [#allocation7], 4294967232 }
  0x19   :  { %1426 = dma.done.wait [#allocation10], 48  }
  0x1a   :  { %1427 = vsyncadd [#allocation10], 4294967248 }
  0x1b   :  { %1428 = dma.done.wait [#allocation13], 32  }
  0x1c   :  { %1429 = vsyncadd [#allocation13], 4294967264  ;;  %v140_v0 = vld [vmem:[%s1688_s5 + $0x4] sm:$0x3]  ;;  %vm164_vm0 = vcmask 1043456   ;;  %v1166_v4 = vld [vmem:[%s1689_s6 + $0x8] sm:$0xff]  }
  0x1d   :  { %v139_v1 = vld [vmem:[%s1688_s5] sm:$0xf]  ;;  %v142_v2 = vunpack.c.l.bf16 %v140_v0  ;;  %v1141_v6 = vunpack.c.h.bf16 %v1166_v4  ;;  %v1140_v7 = vunpack.c.l.bf16 %v1166_v4  ;;  %vm157_vm1 = vcmask 97280   ;;  %v1179_v12 = vld [vmem:[#allocation11] ss:$0 sm:$0xff]  ;;  %s1437_s5 = smov 64  }
  0x1e   :  { %v141_v3 = vunpack.c.l.bf16 %v139_v1  ;;  %v1135_v5 = vld [vmem:[%s1689_s6] sm:$0xff]   ;;  %vm196_vm2 = vcmask 261120   ;;  %s1438_s6 = smov 32   ;;  %v152_v44 = vld [vmem:[%s1683_s0 + $0x8] sm:$0xff]  ;;  %vm673_vm3 = vcmask 254976  }
  0x1f   :  { %1112 = vmatpush.msk.msra.mxu0 %vm164_vm0, %v142_v2  ;;  %v151_v8 = vld [vmem:[%s1683_s0] sm:$0xff]  ;;  %212 = vmatpush.msra.mxu1 %v1141_v6  ;;  %v1137_v9 = vunpack.c.h.bf16 %v1135_v5  ;;  %v1136_v10 = vunpack.c.l.bf16 %v1135_v5 }
  0x20   :  { %263 = vmatpush.msra.mxu2 %v1141_v6  ;;  %451 = vmatpush.msra.mxu3 %v1141_v6  ;;  %v193_v11 = vld [vmem:[#allocation4] sm:$0x3]  ;;  %v194_v19 = vld [vmem:[#allocation6] sm:$0x3] }
  0x21   :  { %183 = vmatpush.msra.mxu0 %v141_v3  ;;  %213 = vmatpush.msra.mxu1 %v1140_v7 }
  0x22   :  { %1113 = vmatmul.msk.f32.vlgmr.msra.gmra.mxu0 %vm157_vm1, %v151_v8  ;;  %264 = vmatpush.msra.mxu2 %v1140_v7 }
  0x23   :  { %310 = vmatpush.msrb.mxu0 %v1141_v6  ;;  %214 = vmatpush.msra.mxu1 %v1137_v9 }
  0x24   :  { %452 = vmatpush.msra.mxu3 %v1140_v7  ;;  %265 = vmatpush.msra.mxu2 %v1137_v9 }
  0x25   :  { %311 = vmatpush.msrb.mxu0 %v1140_v7  ;;  %215 = vmatpush.msra.mxu1 %v1136_v10 }
  0x26   :  { %453 = vmatpush.msra.mxu3 %v1137_v9  ;;  %1115 = vmatmul.msk.f32.vlgmr.msra.gmra.mxu1 %vm196_vm2, %v193_v11 }
  0x27   :  { %266 = vmatpush.msra.mxu2 %v1136_v10  ;;  %312 = vmatpush.msrb.mxu0 %v1137_v9 }
  0x28   :  { %357 = vmatpush.msrb.mxu1 %v1141_v6  ;;  %454 = vmatpush.msra.mxu3 %v1136_v10 }
  0x29   :  { %404 = vmatpush.msrb.mxu2 %v1141_v6  ;;  %313 = vmatpush.msrb.mxu0 %v1136_v10 }
  0x2a   :  { %358 = vmatpush.msrb.mxu1 %v1140_v7  ;;  %1114 = vmatmul.msk.f32.gmra.mxu0 %vm157_vm1, %v152_v44 }
  0x2b   :  { %405 = vmatpush.msrb.mxu2 %v1140_v7  ;;  %498 = vmatpush.msra.mxu0 %v1141_v6 }
  0x2c   :  { %359 = vmatpush.msrb.mxu1 %v1137_v9 }
  0x2d   :  { %406 = vmatpush.msrb.mxu2 %v1137_v9  ;;  %499 = vmatpush.msra.mxu0 %v1140_v7 }
  0x2e   :  { %360 = vmatpush.msrb.mxu1 %v1136_v10 }
  0x2f   :  { %407 = vmatpush.msrb.mxu2 %v1136_v10  ;;  %500 = vmatpush.msra.mxu0 %v1137_v9 }
  0x30   :  { %545 = vmatpush.msra.mxu1 %v1141_v6 }
  0x31   :  { %501 = vmatpush.msra.mxu0 %v1136_v10 }
  0x32   :  { %546 = vmatpush.msra.mxu1 %v1140_v7 }
  0x34   :  { %547 = vmatpush.msra.mxu1 %v1137_v9 }
  0x36   :  { %548 = vmatpush.msra.mxu1 %v1136_v10 }
  0x9f   :  { %v185_v13 = vpop.f32.mrf.mxu0 }
  0xa0   :  { %v186_v14 = vadd.f32 %v1179_v12, %v185_v13 }
  0xa2   :  { %191 = vst [vmem:[#allocation2] sm:$0xff] %v186_v14 }
  0xa3   :  { %v217_v15 = vpop.f32.mrf.mxu1 }
  0xa7   :  { %v188_v48 = vpop.f32.mrf.mxu0 }
  0xa8   :  { %v189_v49 = vadd.f32 %v1179_v12, %v188_v48 }
  0xa9   :  { %v195_v16 = vld [vmem:[#allocation2] sm:$0x3]  ;;  %v245_v32 = vld [vmem:[#allocation2 + $0x2] sm:$0x3]  ;;  %v292_v50 = vld [vmem:[#allocation2 + $0x4] sm:$0x3] }
  0xaa   :  { %v220_v17 = vadd.f32 %v217_v15, %v195_v16  ;;  %192 = vst [vmem:[#allocation2 + $0x8] sm:$0xff] %v189_v49  ;;  %v339_v1 = vld [vmem:[#allocation2 + $0x6] sm:$0x3] }
  0xac   :  { %1182 = vtanh.f32 %v220_v17 }
  0xb1   :  { %v386_v16 = vld [vmem:[#allocation2 + $0x8] sm:$0x3] }
  0xb2   :  { %v1183_v18 = vpop.eup %1182 }
  0xb3   :  { %230 = vrot.lane.b32.xlu0 %v1183_v18, %s1437_s5  ;;  %v222_v20 = vmul.f32 0.5, %v1183_v18 }
  0xb5   :  { %v223_v21 = vadd.f32 0.5, %v222_v20 }
  0xbb   :  { %225 = vrot.lane.b32.xlu0 %v194_v19, %s1438_s6 }
 0x125   :  { %v231_v22 = vpop.permute.xlu0 %230 }
 0x126   :  { %v233_v23 = vmul.f32 %v231_v22, %v223_v21 }
 0x128   :  { %235 = vrot.lane.b32.xlu1 %v233_v23, %s1438_s6 }
 0x12d   :  { %v226_v24 = vpop.permute.xlu0 %225 }
 0x12e   :  { %v228_v25 = vmul.f32 %v226_v24, %v223_v21 }
 0x19a   :  { %v236_v26 = vpop.permute.xlu1 %235 }
 0x19b   :  { %v238_v27 = vadd.f32 %v236_v26, %v228_v25 }
 0x19d   :  { %1184 = vtanh.f32 %v238_v27 }
 0x1a3   :  { %v1185_v28 = vpop.eup %1184 }
 0x1a4   :  { %241 = vrot.lane.b32.xlu1 %v1185_v28, %s1437_s5 }
 0x216   :  { %v242_v29 = vpop.permute.xlu1 %241 }
 0x217   :  { %v244_v30 = vmul.f32 %v242_v29, %v223_v21 }
 0x219   :  { %247 = vrot.lane.b32.xlu2 %v244_v30, %s1438_s6 }
 0x273   :  { %v248_v31 = vpop.permute.xlu2 %247 }
 0x274   :  { %1116 = vmatmul.msk.f32.vlgmr.msra.gmra.mxu2 %vm196_vm2, %v248_v31  ;;  %v433_v31 = vld [vmem:[#allocation2 + $0xa] sm:$0x3] }
 0x2f7   :  { %v268_v33 = vpop.f32.mrf.mxu2 }
 0x2f8   :  { %v271_v34 = vadd.f32 %v268_v33, %v245_v32 }
 0x2fa   :  { %1186 = vtanh.f32 %v271_v34 }
 0x300   :  { %v1187_v35 = vpop.eup %1186 }
 0x301   :  { %277 = vrot.lane.b32.xlu2 %v1187_v35, %s1437_s5  ;;  %v273_v36 = vmul.f32 0.5, %v1187_v35 }
 0x303   :  { %v274_v37 = vadd.f32 0.5, %v273_v36 }
 0x305   :  { %v275_v40 = vmul.f32 %v274_v37, %v238_v27 }
 0x35b   :  { %v278_v38 = vpop.permute.xlu2 %277 }
 0x35c   :  { %v280_v39 = vmul.f32 %v278_v38, %v274_v37 }
 0x35e   :  { %282 = vrot.lane.b32.xlu0 %v280_v39, %s1438_s6 }
 0x3d0   :  { %v283_v41 = vpop.permute.xlu0 %282 }
 0x3d1   :  { %v285_v42 = vadd.f32 %v283_v41, %v275_v40 }
 0x3d3   :  { %1188 = vtanh.f32 %v285_v42 }
 0x3d9   :  { %v1189_v43 = vpop.eup %1188 }
 0x3da   :  { %288 = vrot.lane.b32.xlu1 %v1189_v43, %s1437_s5 }
 0x44c   :  { %v289_v45 = vpop.permute.xlu1 %288 }
 0x44d   :  { %v291_v46 = vmul.f32 %v289_v45, %v274_v37 }
 0x44f   :  { %294 = vrot.lane.b32.xlu2 %v291_v46, %s1438_s6  ;;  %v480_v46 = vld [vmem:[#allocation2 + $0xc] sm:$0x3] }
 0x4a9   :  { %v295_v47 = vpop.permute.xlu2 %294 }
 0x4aa   :  { %1117 = vmatmul.msk.f32.vlgmr.msrb.gmra.mxu0 %vm196_vm2, %v295_v47 }
 0x527   :  { %v315_v51 = vpop.f32.mrf.mxu0 }
 0x528   :  { %v318_v52 = vadd.f32 %v315_v51, %v292_v50 }
 0x52a   :  { %1190 = vtanh.f32 %v318_v52 }
 0x530   :  { %v1191_v53 = vpop.eup %1190 }
 0x531   :  { %324 = vrot.lane.b32.xlu0 %v1191_v53, %s1437_s5  ;;  %v320_v54 = vmul.f32 0.5, %v1191_v53 }
 0x533   :  { %v321_v55 = vadd.f32 0.5, %v320_v54 }
 0x535   :  { %v322_v58 = vmul.f32 %v321_v55, %v285_v42 }
 0x5a3   :  { %v325_v56 = vpop.permute.xlu0 %324 }
 0x5a4   :  { %v327_v57 = vmul.f32 %v325_v56, %v321_v55 }
 0x5a6   :  { %329 = vrot.lane.b32.xlu1 %v327_v57, %s1438_s6 }
 0x618   :  { %v330_v59 = vpop.permute.xlu1 %329 }
 0x619   :  { %v332_v60 = vadd.f32 %v330_v59, %v322_v58 }
 0x61b   :  { %1192 = vtanh.f32 %v332_v60 }
 0x621   :  { %v1193_v61 = vpop.eup %1192 }
 0x622   :  { %335 = vrot.lane.b32.xlu2 %v1193_v61, %s1437_s5  ;;  %v527_v61 = vld [vmem:[#allocation2 + $0xe] sm:$0x3] }
 0x67c   :  { %v336_v62 = vpop.permute.xlu2 %335 }
 0x67d   :  { %v338_v63 = vmul.f32 %v336_v62, %v321_v55 }
 0x67f   :  { %341 = vrot.lane.b32.xlu0 %v338_v63, %s1438_s6 }
 0x6f1   :  { %v342_v0 = vpop.permute.xlu0 %341 }
 0x6f2   :  { %1118 = vmatmul.msk.f32.vlgmr.msrb.gmra.mxu1 %vm196_vm2, %v342_v0 }
 0x76f   :  { %v362_v2 = vpop.f32.mrf.mxu1 }
 0x770   :  { %v365_v3 = vadd.f32 %v362_v2, %v339_v1 }
 0x772   :  { %1194 = vtanh.f32 %v365_v3 }
 0x778   :  { %v1195_v4 = vpop.eup %1194 }
 0x779   :  { %371 = vrot.lane.b32.xlu1 %v1195_v4, %s1437_s5  ;;  %v367_v5 = vmul.f32 0.5, %v1195_v4 }
 0x77b   :  { %v368_v6 = vadd.f32 0.5, %v367_v5 }
 0x77d   :  { %v369_v9 = vmul.f32 %v368_v6, %v332_v60 }
 0x7eb   :  { %v372_v7 = vpop.permute.xlu1 %371 }
 0x7ec   :  { %v374_v8 = vmul.f32 %v372_v7, %v368_v6 }
 0x7ee   :  { %376 = vrot.lane.b32.xlu2 %v374_v8, %s1438_s6 }
 0x848   :  { %v377_v10 = vpop.permute.xlu2 %376 }
 0x849   :  { %v379_v11 = vadd.f32 %v377_v10, %v369_v9  ;;  %v1167_v9 = vld [vmem:[%s1691_s8 + $0x8] sm:$0xff]  }
 0x84a   :  { %v1168_v10 = vld [vmem:[%s1692_s9 + $0x8] sm:$0xff]  }
 0x84b   :  { %1196 = vtanh.f32 %v379_v11 }
 0x851   :  { %v1197_v12 = vpop.eup %1196 }
 0x852   :  { %382 = vrot.lane.b32.xlu0 %v1197_v12, %s1437_s5  ;;  %v1149_v12 = vunpack.c.h.bf16 %v1167_v9 }
 0x854   :  { %611 = vmatpush.msra.mxu2 %v1149_v12 }
 0x8c4   :  { %v383_v13 = vpop.permute.xlu0 %382 }
 0x8c5   :  { %v385_v14 = vmul.f32 %v383_v13, %v368_v6  ;;  %v1148_v13 = vunpack.c.l.bf16 %v1167_v9 }
 0x8c7   :  { %388 = vrot.lane.b32.xlu1 %v385_v14, %s1438_s6  ;;  %v1157_v14 = vunpack.c.h.bf16 %v1168_v10  ;;  %612 = vmatpush.msra.mxu2 %v1148_v13 }
 0x8c9   :  { %636 = vmatpush.msrb.mxu3 %v1157_v14  ;;  %689 = vmatpush.msrb.mxu0 %v1157_v14 }
 0x8ca   :  { %737 = vmatpush.msrb.mxu1 %v1157_v14 }
 0x939   :  { %v389_v15 = vpop.permute.xlu1 %388 }
 0x93a   :  { %1119 = vmatmul.msk.f32.vlgmr.msrb.gmra.mxu2 %vm196_vm2, %v389_v15  ;;  %v1151_v15 = vld [vmem:[%s1692_s9] sm:$0xff]  }
 0x9bd   :  { %v409_v17 = vpop.f32.mrf.mxu2 }
 0x9be   :  { %v412_v18 = vadd.f32 %v409_v17, %v386_v16  ;;  %v1156_v16 = vunpack.c.l.bf16 %v1168_v10 }
 0x9c0   :  { %1198 = vtanh.f32 %v412_v18  ;;  %v1153_v18 = vunpack.c.h.bf16 %v1151_v15  ;;  %637 = vmatpush.msrb.mxu3 %v1156_v16  ;;  %690 = vmatpush.msrb.mxu0 %v1156_v16 }
 0x9c1   :  { %738 = vmatpush.msrb.mxu1 %v1156_v16 }
 0x9c2   :  { %638 = vmatpush.msrb.mxu3 %v1153_v18  ;;  %691 = vmatpush.msrb.mxu0 %v1153_v18 }
 0x9c3   :  { %739 = vmatpush.msrb.mxu1 %v1153_v18 }
 0x9c6   :  { %v1199_v19 = vpop.eup %1198 }
 0x9c7   :  { %418 = vrot.lane.b32.xlu2 %v1199_v19, %s1437_s5  ;;  %v414_v20 = vmul.f32 0.5, %v1199_v19 }
 0x9c9   :  { %v415_v21 = vadd.f32 0.5, %v414_v20 }
 0x9cb   :  { %v416_v24 = vmul.f32 %v415_v21, %v379_v11  ;;  %v1143_v11 = vld [vmem:[%s1691_s8] sm:$0xff]  }
 0x9cc   :  { %v1145_v17 = vunpack.c.h.bf16 %v1143_v11  ;;  %v1144_v19 = vunpack.c.l.bf16 %v1143_v11 }
 0x9ce   :  { %613 = vmatpush.msra.mxu2 %v1145_v17 }
 0x9d0   :  { %614 = vmatpush.msra.mxu2 %v1144_v19 }
 0x9d2   :  { %785 = vmatpush.msrb.mxu2 %v1157_v14 }
 0x9d4   :  { %786 = vmatpush.msrb.mxu2 %v1156_v16 }
 0x9d6   :  { %787 = vmatpush.msrb.mxu2 %v1153_v18 }
 0xa21   :  { %v419_v22 = vpop.permute.xlu2 %418 }
 0xa22   :  { %v421_v23 = vmul.f32 %v419_v22, %v415_v21  ;;  %v1152_v22 = vunpack.c.l.bf16 %v1151_v15 }
 0xa24   :  { %423 = vrot.lane.b32.xlu0 %v421_v23, %s1438_s6  ;;  %v619_v23 = vld [vmem:[#allocation8] sm:$0x3]  ;;  %639 = vmatpush.msrb.mxu3 %v1152_v22 }
 0xa25   :  { %692 = vmatpush.msrb.mxu0 %v1152_v22  ;;  %740 = vmatpush.msrb.mxu1 %v1152_v22 }
 0xa26   :  { %788 = vmatpush.msrb.mxu2 %v1152_v22 }
 0xa96   :  { %v424_v25 = vpop.permute.xlu0 %423 }
 0xa97   :  { %v426_v26 = vadd.f32 %v424_v25, %v416_v24  ;;  %v620_v24 = vld [vmem:[#allocation9] sm:$0x3] }
 0xa99   :  { %1200 = vtanh.f32 %v426_v26 }
 0xa9f   :  { %v1201_v27 = vpop.eup %1200 }
 0xaa0   :  { %429 = vrot.lane.b32.xlu1 %v1201_v27, %s1437_s5 }
 0xb12   :  { %v430_v28 = vpop.permute.xlu1 %429 }
 0xb13   :  { %v432_v29 = vmul.f32 %v430_v28, %v415_v21 }
 0xb15   :  { %435 = vrot.lane.b32.xlu2 %v432_v29, %s1438_s6 }
 0xb6f   :  { %v436_v30 = vpop.permute.xlu2 %435 }
 0xb70   :  { %1120 = vmatmul.msk.f32.vlgmr.msra.gmra.mxu3 %vm196_vm2, %v436_v30 }
 0xb71   :  { %833 = vmatpush.msra.mxu3 %v1157_v14 }
 0xb73   :  { %834 = vmatpush.msra.mxu3 %v1156_v16 }
 0xb75   :  { %835 = vmatpush.msra.mxu3 %v1153_v18 }
 0xb77   :  { %836 = vmatpush.msra.mxu3 %v1152_v22 }
 0xb78   :  { %1124 = vmatmul.msk.f32.vlgmr.msrb.gmra.mxu3 %vm196_vm2, %v619_v23 }
 0xbf3   :  { %v456_v32 = vpop.f32.mrf.mxu3 }
 0xbf4   :  { %v459_v33 = vadd.f32 %v456_v32, %v433_v31 }
 0xbf6   :  { %1202 = vtanh.f32 %v459_v33 }
 0xbfb   :  { %v641_v28 = vpop.f32.mrf.mxu3 }
 0xbfc   :  { %v1203_v34 = vpop.eup %1202 }
 0xbfd   :  { %465 = vrot.lane.b32.xlu0 %v1203_v34, %s1437_s5  ;;  %v461_v35 = vmul.f32 0.5, %v1203_v34 }
 0xbff   :  { %v462_v36 = vadd.f32 0.5, %v461_v35 }
 0xc01   :  { %v463_v39 = vmul.f32 %v462_v36, %v426_v26  ;;  %v1180_v26 = vld [vmem:[#allocation12] ss:$0 sm:$0xff] }
 0xc6f   :  { %v466_v37 = vpop.permute.xlu0 %465 }
 0xc70   :  { %v468_v38 = vmul.f32 %v466_v37, %v462_v36 }
 0xc72   :  { %470 = vrot.lane.b32.xlu1 %v468_v38, %s1438_s6 }
 0xce4   :  { %v471_v40 = vpop.permute.xlu1 %470 }
 0xce5   :  { %v473_v41 = vadd.f32 %v471_v40, %v463_v39 }
 0xce7   :  { %1204 = vtanh.f32 %v473_v41 }
 0xced   :  { %v1205_v42 = vpop.eup %1204 }
 0xcee   :  { %476 = vrot.lane.b32.xlu2 %v1205_v42, %s1437_s5 }
 0xd48   :  { %v477_v43 = vpop.permute.xlu2 %476 }
 0xd49   :  { %v479_v44 = vmul.f32 %v477_v43, %v462_v36 }
 0xd4b   :  { %482 = vrot.lane.b32.xlu0 %v479_v44, %s1438_s6 }
 0xdbd   :  { %v483_v45 = vpop.permute.xlu0 %482 }
 0xdbe   :  { %1121 = vmatmul.msk.f32.vlgmr.msra.gmra.mxu0 %vm196_vm2, %v483_v45 }
 0xdbf   :  { %881 = vmatpush.msra.mxu0 %v1157_v14 }
 0xdc1   :  { %882 = vmatpush.msra.mxu0 %v1156_v16 }
 0xdc3   :  { %883 = vmatpush.msra.mxu0 %v1153_v18 }
 0xdc5   :  { %884 = vmatpush.msra.mxu0 %v1152_v22 }
 0xe3b   :  { %v503_v47 = vpop.f32.mrf.mxu0 }
 0xe3c   :  { %v506_v48 = vadd.f32 %v503_v47, %v480_v46 }
 0xe3e   :  { %1206 = vtanh.f32 %v506_v48 }
 0xe44   :  { %v1207_v49 = vpop.eup %1206 }
 0xe45   :  { %512 = vrot.lane.b32.xlu1 %v1207_v49, %s1437_s5  ;;  %v508_v50 = vmul.f32 0.5, %v1207_v49 }
 0xe47   :  { %v509_v51 = vadd.f32 0.5, %v508_v50 }
 0xe49   :  { %v510_v54 = vmul.f32 %v509_v51, %v473_v41 }
 0xeb7   :  { %v513_v52 = vpop.permute.xlu1 %512 }
 0xeb8   :  { %v515_v53 = vmul.f32 %v513_v52, %v509_v51 }
 0xeba   :  { %517 = vrot.lane.b32.xlu2 %v515_v53, %s1438_s6 }
 0xf14   :  { %v518_v55 = vpop.permute.xlu2 %517 }
 0xf15   :  { %v520_v56 = vadd.f32 %v518_v55, %v510_v54 }
 0xf17   :  { %1208 = vtanh.f32 %v520_v56 }
 0xf1d   :  { %v1209_v57 = vpop.eup %1208 }
 0xf1e   :  { %523 = vrot.lane.b32.xlu0 %v1209_v57, %s1437_s5 }
 0xf90   :  { %v524_v58 = vpop.permute.xlu0 %523 }
 0xf91   :  { %v526_v59 = vmul.f32 %v524_v58, %v509_v51 }
 0xf93   :  { %529 = vrot.lane.b32.xlu1 %v526_v59, %s1438_s6 }
0x1005   :  { %v530_v60 = vpop.permute.xlu1 %529 }
0x1006   :  { %1122 = vmatmul.msk.f32.vlgmr.msra.gmra.mxu1 %vm196_vm2, %v530_v60 }
0x1007   :  { %929 = vmatpush.msra.mxu1 %v1157_v14 }
0x1009   :  { %930 = vmatpush.msra.mxu1 %v1156_v16 }
0x100b   :  { %931 = vmatpush.msra.mxu1 %v1153_v18 }
0x100d   :  { %932 = vmatpush.msra.mxu1 %v1152_v22 }
0x1083   :  { %v550_v62 = vpop.f32.mrf.mxu1 }
0x1084   :  { %v553_v63 = vadd.f32 %v550_v62, %v527_v61 }
0x1086   :  { %1210 = vtanh.f32 %v553_v63 }
0x108c   :  { %v1211_v0 = vpop.eup %1210 }
0x108d   :  { %559 = vrot.lane.b32.xlu2 %v1211_v0, %s1437_s5  ;;  %v555_v1 = vmul.f32 0.5, %v1211_v0 }
0x108f   :  { %v556_v2 = vadd.f32 0.5, %v555_v1 }
0x1091   :  { %v557_v5 = vmul.f32 %v556_v2, %v520_v56 }
0x10e7   :  { %v560_v3 = vpop.permute.xlu2 %559 }
0x10e8   :  { %v562_v4 = vmul.f32 %v560_v3, %v556_v2 }
0x10ea   :  { %564 = vrot.lane.b32.xlu0 %v562_v4, %s1438_s6 }
0x115c   :  { %v565_v6 = vpop.permute.xlu0 %564 }
0x115d   :  { %v567_v7 = vadd.f32 %v565_v6, %v557_v5 }
0x115f   :  { %1212 = vtanh.f32 %v567_v7 }
0x1165   :  { %v1213_v8 = vpop.eup %1212 }
0x1166   :  { %570 = vrot.lane.b32.xlu1 %v1213_v8, %s1437_s5 }
0x116e   :  { %649 = vrot.lane.b32.xlu1 %v620_v24, %s1438_s6  ;;  %v1159_v24 = vld [vmem:[%s1694_s11] sm:$0xff]  }
0x11d8   :  { %v571_v20 = vpop.permute.xlu1 %570 }
0x11d9   :  { %v573_v21 = vmul.f32 %v571_v20, %v556_v2 }
0x11db   :  { %595 = vrot.lane.b32.xlu2 %v573_v21, %s1438_s6  ;;  %v1169_v21 = vld [vmem:[%s1694_s11 + $0x8] sm:$0xff]  }
0x11dc   :  { %v1164_v23 = vunpack.c.l.bf16 %v1169_v21 }
0x11e0   :  { %v650_v36 = vpop.permute.xlu1 %649 }
0x1235   :  { %v596_v25 = vpop.permute.xlu2 %595 }
0x1236   :  { %1123 = vmatmul.msk.f32.vlgmr.msra.gmra.mxu2 %vm196_vm2, %v596_v25  ;;  %v1161_v25 = vunpack.c.h.bf16 %v1159_v24 }
0x1237   :  { %977 = vmatpush.msra.mxu2 %v1157_v14 }
0x1239   :  { %978 = vmatpush.msra.mxu2 %v1156_v16 }
0x123b   :  { %979 = vmatpush.msra.mxu2 %v1153_v18 }
0x123d   :  { %980 = vmatpush.msra.mxu2 %v1152_v22  ;;  %v1165_v22 = vunpack.c.h.bf16 %v1169_v21 }
0x123f   :  { %1043 = vmatpush.msrb.mxu3 %v1165_v22 }
0x1241   :  { %1044 = vmatpush.msrb.mxu3 %v1164_v23 }
0x1243   :  { %1045 = vmatpush.msrb.mxu3 %v1161_v25 }
0x12b9   :  { %v616_v27 = vpop.f32.mrf.mxu2 }
0x12ba   :  { %v1606_v29 = vadd.f32 %v1180_v26, %v616_v27  ;;  %v1160_v26 = vunpack.c.l.bf16 %v1159_v24 }
0x12bc   :  { %v644_v30 = vadd.f32 %v641_v28, %v1606_v29  ;;  %1046 = vmatpush.msrb.mxu3 %v1160_v26 }
0x12be   :  { %1214 = vtanh.f32 %v644_v30 }
0x12c4   :  { %v1215_v31 = vpop.eup %1214 }
0x12c5   :  { %654 = vrot.lane.b32.xlu0 %v1215_v31, %s1437_s5  ;;  %v646_v32 = vmul.f32 0.5, %v1215_v31 }
0x12c7   :  { %v647_v33 = vadd.f32 0.5, %v646_v32 }
0x12c9   :  { %v652_v37 = vmul.f32 %v650_v36, %v647_v33 }
0x1337   :  { %v655_v34 = vpop.permute.xlu0 %654 }
0x1338   :  { %v657_v35 = vmul.f32 %v655_v34, %v647_v33 }
0x133a   :  { %659 = vrot.lane.b32.xlu2 %v657_v35, %s1438_s6 }
0x1394   :  { %v660_v38 = vpop.permute.xlu2 %659 }
0x1395   :  { %v662_v39 = vadd.f32 %v660_v38, %v652_v37 }
0x1397   :  { %1216 = vtanh.f32 %v662_v39 }
0x139d   :  { %v1217_v40 = vpop.eup %1216 }
0x139e   :  { %665 = vrot.lane.b32.xlu0 %v1217_v40, %s1437_s5 }
0x1410   :  { %v666_v41 = vpop.permute.xlu0 %665 }
0x1411   :  { %v668_v42 = vmul.f32 %v666_v41, %v647_v33 }
0x1413   :  { %670 = vrot.lane.b32.xlu1 %v668_v42, %s1438_s6 }
0x1485   :  { %v671_v43 = vpop.permute.xlu1 %670 }
0x1486   :  { %674 = vst.msk [vmem:[#allocation3] sm:$0x3] %vm673_vm3, %v671_v43  ;;  %1125 = vmatmul.msk.f32.vlgmr.msrb.gmra.mxu0 %vm196_vm2, %v671_v43 }
0x1503   :  { %v694_v44 = vpop.f32.mrf.mxu0 }
0x1504   :  { %v697_v45 = vadd.f32 %v694_v44, %v1606_v29 }
0x1506   :  { %1218 = vtanh.f32 %v697_v45 }
0x150c   :  { %v1219_v46 = vpop.eup %1218 }
0x150d   :  { %703 = vrot.lane.b32.xlu2 %v1219_v46, %s1437_s5  ;;  %v699_v47 = vmul.f32 0.5, %v1219_v46 }
0x150f   :  { %v700_v48 = vadd.f32 0.5, %v699_v47 }
0x1511   :  { %v701_v51 = vmul.f32 %v700_v48, %v662_v39 }
0x1567   :  { %v704_v49 = vpop.permute.xlu2 %703 }
0x1568   :  { %v706_v50 = vmul.f32 %v704_v49, %v700_v48 }
0x156a   :  { %708 = vrot.lane.b32.xlu0 %v706_v50, %s1438_s6 }
0x15dc   :  { %v709_v52 = vpop.permute.xlu0 %708 }
0x15dd   :  { %v711_v53 = vadd.f32 %v709_v52, %v701_v51 }
0x15df   :  { %1220 = vtanh.f32 %v711_v53 }
0x15e5   :  { %v1221_v54 = vpop.eup %1220 }
0x15e6   :  { %714 = vrot.lane.b32.xlu1 %v1221_v54, %s1437_s5 }
0x1658   :  { %v715_v55 = vpop.permute.xlu1 %714 }
0x1659   :  { %v717_v56 = vmul.f32 %v715_v55, %v700_v48 }
0x165b   :  { %719 = vrot.lane.b32.xlu2 %v717_v56, %s1438_s6 }
0x16b5   :  { %v720_v57 = vpop.permute.xlu2 %719 }
0x16b6   :  { %722 = vst.msk [vmem:[#allocation3 + $0x2] sm:$0x3] %vm673_vm3, %v720_v57  ;;  %1126 = vmatmul.msk.f32.vlgmr.msrb.gmra.mxu1 %vm196_vm2, %v720_v57 }
0x1733   :  { %v742_v58 = vpop.f32.mrf.mxu1 }
0x1734   :  { %v745_v59 = vadd.f32 %v742_v58, %v1606_v29 }
0x1736   :  { %1222 = vtanh.f32 %v745_v59 }
0x173c   :  { %v1223_v60 = vpop.eup %1222 }
0x173d   :  { %751 = vrot.lane.b32.xlu0 %v1223_v60, %s1437_s5  ;;  %v747_v61 = vmul.f32 0.5, %v1223_v60 }
0x173f   :  { %v748_v62 = vadd.f32 0.5, %v747_v61 }
0x1741   :  { %v749_v1 = vmul.f32 %v748_v62, %v711_v53 }
0x17af   :  { %v752_v63 = vpop.permute.xlu0 %751 }
0x17b0   :  { %v754_v0 = vmul.f32 %v752_v63, %v748_v62 }
0x17b2   :  { %756 = vrot.lane.b32.xlu1 %v754_v0, %s1438_s6 }
0x1824   :  { %v757_v2 = vpop.permute.xlu1 %756 }
0x1825   :  { %v759_v3 = vadd.f32 %v757_v2, %v749_v1 }
0x1827   :  { %1224 = vtanh.f32 %v759_v3 }
0x182d   :  { %v1225_v4 = vpop.eup %1224 }
0x182e   :  { %762 = vrot.lane.b32.xlu2 %v1225_v4, %s1437_s5 }
0x1888   :  { %v763_v5 = vpop.permute.xlu2 %762 }
0x1889   :  { %v765_v6 = vmul.f32 %v763_v5, %v748_v62 }
0x188b   :  { %767 = vrot.lane.b32.xlu0 %v765_v6, %s1438_s6 }
0x18fd   :  { %v768_v7 = vpop.permute.xlu0 %767 }
0x18fe   :  { %770 = vst.msk [vmem:[#allocation3 + $0x4] sm:$0x3] %vm673_vm3, %v768_v7  ;;  %1127 = vmatmul.msk.f32.vlgmr.msrb.gmra.mxu2 %vm196_vm2, %v768_v7 }
0x1981   :  { %v790_v8 = vpop.f32.mrf.mxu2 }
0x1982   :  { %v793_v9 = vadd.f32 %v790_v8, %v1606_v29 }
0x1984   :  { %1226 = vtanh.f32 %v793_v9 }
0x198a   :  { %v1227_v10 = vpop.eup %1226 }
0x198b   :  { %799 = vrot.lane.b32.xlu1 %v1227_v10, %s1437_s5  ;;  %v795_v11 = vmul.f32 0.5, %v1227_v10 }
0x198d   :  { %v796_v12 = vadd.f32 0.5, %v795_v11 }
0x198f   :  { %v797_v15 = vmul.f32 %v796_v12, %v759_v3 }
0x19fd   :  { %v800_v13 = vpop.permute.xlu1 %799 }
0x19fe   :  { %v802_v14 = vmul.f32 %v800_v13, %v796_v12 }
0x1a00   :  { %804 = vrot.lane.b32.xlu2 %v802_v14, %s1438_s6 }
0x1a5a   :  { %v805_v16 = vpop.permute.xlu2 %804 }
0x1a5b   :  { %v807_v17 = vadd.f32 %v805_v16, %v797_v15  ;;  %v1181_v15 = vld [vmem:[#allocation14] ss:$0 sm:$0xff] }
0x1a5d   :  { %1228 = vtanh.f32 %v807_v17 }
0x1a63   :  { %v1229_v18 = vpop.eup %1228 }
0x1a64   :  { %810 = vrot.lane.b32.xlu0 %v1229_v18, %s1437_s5 }
0x1ad6   :  { %v811_v19 = vpop.permute.xlu0 %810 }
0x1ad7   :  { %v813_v20 = vmul.f32 %v811_v19, %v796_v12 }
0x1ad9   :  { %815 = vrot.lane.b32.xlu1 %v813_v20, %s1438_s6 }
0x1b4b   :  { %v816_v27 = vpop.permute.xlu1 %815 }
0x1b4c   :  { %818 = vst.msk [vmem:[#allocation3 + $0x6] sm:$0x3] %vm673_vm3, %v816_v27  ;;  %1128 = vmatmul.msk.f32.vlgmr.msra.gmra.mxu3 %vm196_vm2, %v816_v27 }
0x1b53   :  { %v1019_v28 = vld [vmem:[#allocation3] sm:$0xff] }
0x1b54   :  { %1132 = vmatmul.msk.f32.vlgmr.msrb.gmra.mxu3 %vm196_vm2, %v1019_v28 }
0x1bcf   :  { %v838_v30 = vpop.f32.mrf.mxu3 }
0x1bd0   :  { %v841_v31 = vadd.f32 %v838_v30, %v1606_v29 }
0x1bd2   :  { %1230 = vtanh.f32 %v841_v31 }
0x1bd7   :  { %v1048_v16 = vpop.f32.mrf.mxu3 }
0x1bd8   :  { %v1231_v32 = vpop.eup %1230 }
0x1bd9   :  { %847 = vrot.lane.b32.xlu2 %v1231_v32, %s1437_s5  ;;  %v843_v33 = vmul.f32 0.5, %v1231_v32 }
0x1bdb   :  { %v844_v34 = vadd.f32 0.5, %v843_v33 }
0x1bdd   :  { %v845_v37 = vmul.f32 %v844_v34, %v807_v17  ;;  %v1049_v17 = vadd.f32 %v1181_v15, %v1048_v16 }
0x1bdf   :  { %v1054_v18 = vsel %vm157_vm1, %v1049_v17, -inf }
0x1c33   :  { %v848_v35 = vpop.permute.xlu2 %847 }
0x1c34   :  { %v850_v36 = vmul.f32 %v848_v35, %v844_v34 }
0x1c36   :  { %852 = vrot.lane.b32.xlu0 %v850_v36, %s1438_s6 }
0x1ca8   :  { %v853_v38 = vpop.permute.xlu0 %852 }
0x1ca9   :  { %v855_v39 = vadd.f32 %v853_v38, %v845_v37 }
0x1cab   :  { %1232 = vtanh.f32 %v855_v39 }
0x1cb1   :  { %v1233_v40 = vpop.eup %1232 }
0x1cb2   :  { %858 = vrot.lane.b32.xlu1 %v1233_v40, %s1437_s5 }
0x1d24   :  { %v859_v41 = vpop.permute.xlu1 %858 }
0x1d25   :  { %v861_v42 = vmul.f32 %v859_v41, %v844_v34 }
0x1d27   :  { %863 = vrot.lane.b32.xlu2 %v861_v42, %s1438_s6 }
0x1d81   :  { %v864_v43 = vpop.permute.xlu2 %863 }
0x1d82   :  { %866 = vst.msk [vmem:[#allocation3 + $0x8] sm:$0x3] %vm673_vm3, %v864_v43  ;;  %1129 = vmatmul.msk.f32.vlgmr.msra.gmra.mxu0 %vm196_vm2, %v864_v43 }
0x1dff   :  { %v886_v44 = vpop.f32.mrf.mxu0 }
0x1e00   :  { %v889_v45 = vadd.f32 %v886_v44, %v1606_v29 }
0x1e02   :  { %1234 = vtanh.f32 %v889_v45 }
0x1e08   :  { %v1235_v46 = vpop.eup %1234 }
0x1e09   :  { %895 = vrot.lane.b32.xlu0 %v1235_v46, %s1437_s5  ;;  %v891_v47 = vmul.f32 0.5, %v1235_v46 }
0x1e0b   :  { %v892_v48 = vadd.f32 0.5, %v891_v47 }
0x1e0d   :  { %v893_v51 = vmul.f32 %v892_v48, %v855_v39 }
0x1e7b   :  { %v896_v49 = vpop.permute.xlu0 %895 }
0x1e7c   :  { %v898_v50 = vmul.f32 %v896_v49, %v892_v48 }
0x1e7e   :  { %900 = vrot.lane.b32.xlu1 %v898_v50, %s1438_s6 }
0x1ef0   :  { %v901_v52 = vpop.permute.xlu1 %900 }
0x1ef1   :  { %v903_v53 = vadd.f32 %v901_v52, %v893_v51 }
0x1ef3   :  { %1236 = vtanh.f32 %v903_v53 }
0x1ef9   :  { %v1237_v54 = vpop.eup %1236 }
0x1efa   :  { %906 = vrot.lane.b32.xlu2 %v1237_v54, %s1437_s5 }
0x1f54   :  { %v907_v55 = vpop.permute.xlu2 %906 }
0x1f55   :  { %v909_v56 = vmul.f32 %v907_v55, %v892_v48 }
0x1f57   :  { %911 = vrot.lane.b32.xlu0 %v909_v56, %s1438_s6 }
0x1fc9   :  { %v912_v57 = vpop.permute.xlu0 %911 }
0x1fca   :  { %914 = vst.msk [vmem:[#allocation3 + $0xa] sm:$0x3] %vm673_vm3, %v912_v57  ;;  %1130 = vmatmul.msk.f32.vlgmr.msra.gmra.mxu1 %vm196_vm2, %v912_v57 }
0x2047   :  { %v934_v58 = vpop.f32.mrf.mxu1 }
0x2048   :  { %v937_v59 = vadd.f32 %v934_v58, %v1606_v29 }
0x204a   :  { %1238 = vtanh.f32 %v937_v59 }
0x2050   :  { %v1239_v60 = vpop.eup %1238 }
0x2051   :  { %943 = vrot.lane.b32.xlu1 %v1239_v60, %s1437_s5  ;;  %v939_v61 = vmul.f32 0.5, %v1239_v60 }
0x2053   :  { %v940_v62 = vadd.f32 0.5, %v939_v61 }
0x2055   :  { %v941_v1 = vmul.f32 %v940_v62, %v903_v53 }
0x20c3   :  { %v944_v63 = vpop.permute.xlu1 %943 }
0x20c4   :  { %v946_v0 = vmul.f32 %v944_v63, %v940_v62 }
0x20c6   :  { %948 = vrot.lane.b32.xlu2 %v946_v0, %s1438_s6 }
0x2120   :  { %v949_v2 = vpop.permute.xlu2 %948 }
0x2121   :  { %v951_v3 = vadd.f32 %v949_v2, %v941_v1 }
0x2123   :  { %1240 = vtanh.f32 %v951_v3 }
0x2129   :  { %v1241_v4 = vpop.eup %1240 }
0x212a   :  { %954 = vrot.lane.b32.xlu0 %v1241_v4, %s1437_s5 }
0x219c   :  { %v955_v5 = vpop.permute.xlu0 %954 }
0x219d   :  { %v957_v6 = vmul.f32 %v955_v5, %v940_v62 }
0x219f   :  { %959 = vrot.lane.b32.xlu1 %v957_v6, %s1438_s6 }
0x2211   :  { %v960_v7 = vpop.permute.xlu1 %959 }
0x2212   :  { %962 = vst.msk [vmem:[#allocation3 + $0xc] sm:$0x3] %vm673_vm3, %v960_v7  ;;  %1131 = vmatmul.msk.f32.vlgmr.msra.gmra.mxu2 %vm196_vm2, %v960_v7 }
0x2295   :  { %v982_v8 = vpop.f32.mrf.mxu2 }
0x2296   :  { %v985_v9 = vadd.f32 %v982_v8, %v1606_v29 }
0x2298   :  { %1242 = vtanh.f32 %v985_v9 }
0x229e   :  { %v1243_v10 = vpop.eup %1242 }
0x229f   :  { %991 = vrot.lane.b32.xlu2 %v1243_v10, %s1437_s5  ;;  %v987_v11 = vmul.f32 0.5, %v1243_v10 }
0x22a1   :  { %v988_v12 = vadd.f32 0.5, %v987_v11 }
0x22a3   :  { %v989_v19 = vmul.f32 %v988_v12, %v951_v3 }
0x22f9   :  { %v992_v13 = vpop.permute.xlu2 %991 }
0x22fa   :  { %v994_v14 = vmul.f32 %v992_v13, %v988_v12 }
0x22fc   :  { %996 = vrot.lane.b32.xlu0 %v994_v14, %s1438_s6 }
0x2326   :  { %1055 = vmax.xlane.f32.xlu0 %v1054_v18 }
0x236e   :  { %v997_v20 = vpop.permute.xlu0 %996 }
0x236f   :  { %v999_v21 = vadd.f32 %v997_v20, %v989_v19 }
0x2371   :  { %1244 = vtanh.f32 %v999_v21 }
0x2377   :  { %v1245_v29 = vpop.eup %1244 }
0x2378   :  { %1002 = vrot.lane.b32.xlu1 %v1245_v29, %s1437_s5 }
0x2399   :  { %v1056_v24 = vpop.xlane.xlu0 %1055 }
0x239a   :  { %v1060_v25 = vsub.f32 %v1049_v17, %v1056_v24 }
0x239c   :  { %v1062_v26 = vmul.f32 1.442695, %v1060_v25 }
0x239e   :  { %1246 = vpow2.f32 %v1062_v26 }
0x23a4   :  { %v1247_v27 = vpop.eup %1246 }
0x23a5   :  { %v1066_v28 = vsel %vm157_vm1, %v1247_v27, 0.0 }
0x23ea   :  { %v1003_v22 = vpop.permute.xlu1 %1002 }
0x23eb   :  { %v1005_v23 = vmul.f32 %v1003_v22, %v988_v12 }
0x23ed   :  { %1007 = vrot.lane.b32.xlu2 %v1005_v23, %s1438_s6 }
0x2416   :  { %1067 = vadd.xlane.f32.xlu2 %v1066_v28 }
0x2447   :  { %v1008_v30 = vpop.permute.xlu2 %1007 }
0x2448   :  { %1010 = vst.msk [vmem:[#allocation3 + $0xe] sm:$0x3] %vm673_vm3, %v1008_v30 }
0x244f   :  { %v1020_v31 = vld [vmem:[#allocation3 + $0x8] sm:$0xff] }
0x2450   :  { %1133 = vmatmul.msk.f32.gmra.mxu3 %vm196_vm2, %v1020_v31 }
0x2489   :  { %v1068_v32 = vpop.xlane.xlu2 %1067 }
0x248a   :  { %1248 = vrcp.f32 %v1068_v32  ;;  %v1083_v36 = vand.u32 2147483648, %v1068_v32  ;;  %v1081_v38 = vand.u32 2147483647, %v1068_v32  ;;  %vm1077_vm5 = vweird.f32 %v1068_v32 }
0x248c   :  { %v1084_v40 = vor.u32 1.1754944e-38, %v1083_v36  ;;  %vm1082_vm7 = vcmp.eq.f32.partialorder %v1081_v38, 8.507059e+37 }
0x2490   :  { %v1249_v33 = vpop.eup %1248 }
0x2491   :  { %v1073_v34 = vmul.f32 %v1249_v33, %v1068_v32  ;;  %vm1078_vm4 = vweird.f32 %v1249_v33 }
0x2492   :  { %vm1079_vm6 = vmor %vm1077_vm5, %vm1078_vm4 }
0x2493   :  { %v1074_v35 = vsub.f32 1.0, %v1073_v34 }
0x2495   :  { %v1075_v37 = vmul.f32 %v1249_v33, %v1074_v35 }
0x2497   :  { %v1076_v39 = vadd.f32 %v1249_v33, %v1075_v37 }
0x2499   :  { %v1080_v41 = vsel %vm1079_vm6, %v1249_v33, %v1076_v39 }
0x249a   :  { %v1085_v42 = vsel %vm1082_vm7, %v1084_v40, %v1080_v41 }
0x249b   :  { %v1086_v43 = vmul.f32 %v1247_v27, %v1085_v42 }
0x249d   :  { %1102 = vst.msk [vmem:[%s1696_s13] sm:$0xff] %vm157_vm1, %v1086_v43 }
0x24d3   :  { %v1051_v44 = vpop.f32.mrf.mxu3 }
0x24d4   :  { %v1052_v45 = vadd.f32 %v1181_v15, %v1051_v44 }
0x24d6   :  { %v1057_v46 = vsel %vm157_vm1, %v1052_v45, -inf }
0x24d7   :  { %1058 = vmax.xlane.f32.xlu1 %v1057_v46 }
0x254a   :  { %v1059_v47 = vpop.xlane.xlu1 %1058 }
0x254b   :  { %v1061_v48 = vsub.f32 %v1052_v45, %v1059_v47 }
0x254d   :  { %v1064_v49 = vmul.f32 1.442695, %v1061_v48 }
0x254f   :  { %1250 = vpow2.f32 %v1064_v49 }
0x2555   :  { %v1251_v50 = vpop.eup %1250 }
0x2556   :  { %v1069_v51 = vsel %vm157_vm1, %v1251_v50, 0.0 }
0x2557   :  { %1070 = vadd.xlane.f32.xlu2 %v1069_v51 }
0x25ca   :  { %v1071_v52 = vpop.xlane.xlu2 %1070 }
0x25cb   :  { %1252 = vrcp.f32 %v1071_v52  ;;  %v1098_v56 = vand.u32 2147483648, %v1071_v52  ;;  %v1096_v58 = vand.u32 2147483647, %v1071_v52  ;;  %vm1092_vm9 = vweird.f32 %v1071_v52 }
0x25cd   :  { %v1099_v60 = vor.u32 1.1754944e-38, %v1098_v56  ;;  %vm1097_vm11 = vcmp.eq.f32.partialorder %v1096_v58, 8.507059e+37 }
0x25d1   :  { %v1253_v53 = vpop.eup %1252 }
0x25d2   :  { %v1088_v54 = vmul.f32 %v1253_v53, %v1071_v52  ;;  %vm1093_vm8 = vweird.f32 %v1253_v53 }
0x25d3   :  { %vm1094_vm10 = vmor %vm1092_vm9, %vm1093_vm8 }
0x25d4   :  { %v1089_v55 = vsub.f32 1.0, %v1088_v54 }
0x25d6   :  { %v1090_v57 = vmul.f32 %v1253_v53, %v1089_v55 }
0x25d8   :  { %v1091_v59 = vadd.f32 %v1253_v53, %v1090_v57 }
0x25da   :  { %v1095_v61 = vsel %vm1094_vm10, %v1253_v53, %v1091_v59 }
0x25db   :  { %v1100_v62 = vsel %vm1097_vm11, %v1099_v60, %v1095_v61 }
0x25dc   :  { %v1101_v63 = vmul.f32 %v1251_v50, %v1100_v62 }
0x25de   :  { %1103 = vst.msk [vmem:[%s1696_s13 + $0x8] sm:$0xff] %vm157_vm1, %v1101_v63 }
0x25df   :  { %1108 = vsyncpa [#allocation5], 1 }
0x25e0   :  { %1109 = vsyncpa [#allocation7], 1 }
0x25e1   :  { %1110 = vsyncpa [#allocation10], 1 }
0x25e2   :  { %1111 = vsyncpa [#allocation13], 1 }

</bundles_post_ra>
